<compile_context>
chip_gen: v5e
topology: v5e:2x2
jax: 0.10.0
libtpu: 0.0.40
codegen_flags: <defaults>
</compile_context>

<pallas_src>
import jax
import jax.numpy as jnp
import numpy as np
from jax import lax
from jax.experimental import pallas as pl
from jax.experimental.pallas import tpu as pltpu

OUT_PAD = 128  # lane-dense padded width for the 2-way logits


# ----------------------------- Pallas kernel ---------------------------------

def make_cnn_kernel(tb, S_src, S_tgt, E, V_src, V_tot,
                    filter_sizes, num_filters, feature_dim):
    n_groups = len(filter_sizes)

    def gather_onehot(ids, table):
        # ids: (tb, S) int32; table: (V_tot, E) f32 -> (tb*S, E) f32
        S = ids.shape[1]
        iota = lax.broadcasted_iota(jnp.int32, (tb, S, V_tot), 2)
        onehot = (iota == ids[:, :, None]).astype(jnp.float32).reshape(tb * S, V_tot)
        return jnp.dot(onehot, table, preferred_element_type=jnp.float32)

    def conv_relu_pool(emb_flat, w_ref, row0, bias, f, n, S):
        # emb_flat: (tb*S, E); w_ref: (2*f, E, n) ref; bias: (1, n) -> (tb, n)
        T = S - f + 1
        emb3 = emb_flat.reshape(tb, S, E)
        acc = None
        for df in range(f):  # f is tiny & static; each dot covers all batches at once
            win = emb3[:, df:df + T, :].reshape(tb * T, E)
            part = jnp.dot(win, w_ref[row0 + df], preferred_element_type=jnp.float32)
            acc = part if acc is None else acc + part
        acc = jnp.maximum(acc + bias, 0.0)                    # (tb*T, n), bias added once
        return jnp.max(acc.reshape(tb, T, n), axis=1)         # max-pool over time -> (tb, n)

    def kernel(src_ids_ref, tgt_ids_ref, emb_ref, *rest):
        w_refs = rest[:n_groups]
        b_conv_ref = rest[n_groups]
        mlp_ref = rest[n_groups + 1]
        out_ref = rest[n_groups + 2]

        table = emb_ref[...]                                  # (V_tot, E)
        src_emb = gather_onehot(src_ids_ref[...], table)              # (tb*S_src, E)
        tgt_emb = gather_onehot(tgt_ids_ref[...] + V_src, table)      # (tb*S_tgt, E)

        b_conv = b_conv_ref[...]                              # (1, 2*sum(n))
        pools = []
        off = 0
        for g, (f, n) in enumerate(zip(filter_sizes, num_filters)):
            b_src = b_conv[:, off:off + n]
            b_tgt = b_conv[:, off + n:off + 2 * n]
            off += 2 * n
            p_src = conv_relu_pool(src_emb, w_refs[g], 0, b_src, f, n, S_src)
            p_tgt = conv_relu_pool(tgt_emb, w_refs[g], f, b_tgt, f, n, S_tgt)
            # torch concatenates the ReLU'd conv outputs along time and max-pools the
            # full length; that equals the elementwise max of the two per-side pools.
            pools.append(jnp.maximum(p_src, p_tgt))

        pred = jnp.concatenate(pools, axis=1) if len(pools) > 1 else pools[0]  # (tb, F)

        F = feature_dim
        mlp = mlp_ref[...]                                    # (F+1, F+OUT_PAD)
        w_h, b_h = mlp[:F, :F], mlp[F:F + 1, :F]
        w_o, b_o = mlp[:F, F:], mlp[F:F + 1, F:]              # zero-padded to 128 cols

        h = jnp.dot(pred, w_h, preferred_element_type=jnp.float32) + b_h
        s = 1.0 / (1.0 + jnp.exp(-h))                         # sigmoid
        feature = s * jnp.maximum(h, 0.0) + (1.0 - s) * pred
        # TODO(synk): nn.Dropout is identity at inference; not implemented in-kernel.
        out_ref[...] = jnp.dot(feature, w_o,
                               preferred_element_type=jnp.float32) + b_o   # (tb, 128)

    return kernel


# ----------------------------- JAX wrapper ------------------------------------

def pack_params(params, filter_sizes, num_filters):
    """Pre-concatenate the many tiny parameter arrays into a few DMA-friendly slabs."""
    F = sum(num_filters)
    n_out = params["w_o"].shape[1]
    V_src = params["src_emb"].shape[0]

    emb_table = jnp.concatenate([params["src_emb"], params["tgt_emb"]], axis=0)

    w_slabs, b_parts = [], []
    for i in range(len(filter_sizes)):
        # (2*f, E, n): rows [0:f] = src conv, rows [f:2f] = tgt conv
        w_slabs.append(jnp.concatenate([params[f"w_src_{i}"], params[f"w_tgt_{i}"]],
                                       axis=0))
        b_parts += [params[f"b_src_{i}"], params[f"b_tgt_{i}"]]
    b_conv = jnp.concatenate(b_parts, axis=1)                      # (1, 2*F)

    w_o_pad = jnp.zeros((F, OUT_PAD), jnp.float32).at[:, :n_out].set(params["w_o"])
    b_o_pad = jnp.zeros((1, OUT_PAD), jnp.float32).at[:, :n_out].set(params["b_o"])
    top = jnp.concatenate([params["w_h"], w_o_pad], axis=1)        # (F, F+128)
    bot = jnp.concatenate([params["b_h"], b_o_pad], axis=1)        # (1, F+128)
    mlp = jnp.concatenate([top, bot], axis=0)                      # (F+1, F+128)

    return dict(emb_table=emb_table, w_slabs=tuple(w_slabs), b_conv=b_conv,
                mlp=mlp, V_src=V_src, n_out=n_out)


def cnn_forward(src_tokens, tgt_tokens, packed, filter_sizes, num_filters):
    emb_table = packed["emb_table"]
    w_slabs = packed["w_slabs"]
    b_conv = packed["b_conv"]
    mlp = packed["mlp"]
    V_src, n_out = packed["V_src"], packed["n_out"]

    B, S_src = src_tokens.shape
    _, S_tgt = tgt_tokens.shape
    V_tot, E = emb_table.shape
    F = sum(num_filters)

    # Batch tile: full batch at toy scale (grid=(1,)). For larger B, pick a multiple
    # of 8 so the parallel batch axis shards across v7x's two TensorCores.
    tb = B
    grid = (B // tb,)

    kernel = make_cnn_kernel(tb, S_src, S_tgt, E, V_src, V_tot,
                             tuple(filter_sizes), tuple(num_filters), F)

    def full_spec(shape):
        zeros = (0,) * len(shape)
        return pl.BlockSpec(tuple(shape), lambda i, _z=zeros: _z)

    in_specs = [
        pl.BlockSpec((tb, S_src), lambda i: (i, 0)),   # src token ids
        pl.BlockSpec((tb, S_tgt), lambda i: (i, 0)),   # tgt token ids
        full_spec(emb_table.shape),                    # packed embedding table
    ]
    in_specs += [full_spec(w.shape) for w in w_slabs]  # conv weight slabs
    in_specs += [full_spec(b_conv.shape), full_spec(mlp.shape)]

    out = pl.pallas_call(
        kernel,
        grid=grid,
        in_specs=in_specs,
        out_specs=pl.BlockSpec((tb, OUT_PAD), lambda i: (i, 0)),
        out_shape=jax.ShapeDtypeStruct((B, OUT_PAD), jnp.float32),
        compiler_params=pltpu.CompilerParams(dimension_semantics=("parallel",)),
    )(src_tokens.astype(jnp.int32), tgt_tokens.astype(jnp.int32),
      emb_table, *w_slabs, b_conv, mlp)

    return out[:, :n_out]   # drop lane padding


# -------------------------- Params & pure-JAX reference -----------------------

def init_params(key, E, src_vocab, tgt_vocab, filter_sizes, num_filters):
    feature_dim = sum(num_filters)
    keys = iter(jax.random.split(key, 6 + 4 * len(filter_sizes)))
    params = {}
    src_emb = 0.1 * jax.random.normal(next(keys), (src_vocab, E), jnp.float32)
    tgt_emb = 0.1 * jax.random.normal(next(keys), (tgt_vocab, E), jnp.float32)
    pad = 1  # padding_idx
    params["src_emb"] = src_emb.at[pad].set(0.0)
    params["tgt_emb"] = tgt_emb.at[pad].set(0.0)
    for i, (f, n) in enumerate(zip(filter_sizes, num_filters)):
        params[f"w_src_{i}"] = 0.1 * jax.random.normal(next(keys), (f, E, n), jnp.float32)
        params[f"b_src_{i}"] = 0.1 * jax.random.normal(next(keys), (1, n), jnp.float32)
        params[f"w_tgt_{i}"] = 0.1 * jax.random.normal(next(keys), (f, E, n), jnp.float32)
        params[f"b_tgt_{i}"] = 0.1 * jax.random.normal(next(keys), (1, n), jnp.float32)
    params["w_h"] = 0.1 * jax.random.normal(next(keys), (feature_dim, feature_dim), jnp.float32)
    params["b_h"] = 0.1 * jax.random.normal(next(keys), (1, feature_dim), jnp.float32)
    params["w_o"] = 0.1 * jax.random.normal(next(keys), (feature_dim, 2), jnp.float32)
    params["b_o"] = 0.1 * jax.random.normal(next(keys), (1, 2), jnp.float32)
    return params


def cnn_reference(src_tokens, tgt_tokens, params, filter_sizes, num_filters):
    src_emb = params["src_emb"][src_tokens]
    tgt_emb = params["tgt_emb"][tgt_tokens]

    def conv_relu(emb, w, b, f):
        B, S, E = emb.shape
        T = S - f + 1
        acc = sum(jnp.einsum("bte,eo->bto", emb[:, df:df + T, :], w[df]) for df in range(f))
        return jnp.maximum(acc + b[None, :, :], 0.0)      # (B, T, n)

    pools = []
    for i, (f, n) in enumerate(zip(filter_sizes, num_filters)):
        cs = conv_relu(src_emb, params[f"w_src_{i}"], params[f"b_src_{i}"], f)
        ct = conv_relu(tgt_emb, params[f"w_tgt_{i}"], params[f"b_tgt_{i}"], f)
        cat = jnp.concatenate([cs, ct], axis=1)           # concat along time
        pools.append(jnp.max(cat, axis=1))                # max-pool over full length
    pred = jnp.concatenate(pools, axis=1)
    h = pred @ params["w_h"] + params["b_h"]
    s = 1.0 / (1.0 + jnp.exp(-h))
    feature = s * jnp.maximum(h, 0.0) + (1.0 - s) * pred
    return feature @ params["w_o"] + params["b_o"]


# ----------------------------------- main --------------------------------------

if __name__ == "__main__":
    E = 32
    src_vocab, tgt_vocab = 50, 60
    filter_sizes = [2, 3]
    num_filters = [8, 8]
    B, S_src, S_tgt = 2, 10, 12

    key = jax.random.PRNGKey(0)
    kp, ks, kt = jax.random.split(key, 3)
    params = init_params(kp, E, src_vocab, tgt_vocab, filter_sizes, num_filters)
    src_tokens = jax.random.randint(ks, (B, S_src), 0, src_vocab, dtype=jnp.int32)
    tgt_tokens = jax.random.randint(kt, (B, S_tgt), 0, tgt_vocab, dtype=jnp.int32)

    packed = pack_params(params, filter_sizes, num_filters)
    out = cnn_forward(src_tokens, tgt_tokens, packed, filter_sizes, num_filters)
    out = jax.block_until_ready(out)

    ref = cnn_reference(src_tokens, tgt_tokens, params, filter_sizes, num_filters)
    np.testing.assert_allclose(np.asarray(out), np.asarray(ref), rtol=1e-2, atol=1e-2)
    print("KERNEL_OK")
</pallas_src>

<mosaic_0001>
module attributes {stable_mosaic.version = 11 : i64} {
  func.func @kernel(%arg0: i32, %arg1: memref<2x10xi32, #tpu.memory_space<vmem>>, %arg2: memref<2x12xi32, #tpu.memory_space<vmem>>, %arg3: memref<110x32xf32, #tpu.memory_space<vmem>>, %arg4: memref<4x32x8xf32, #tpu.memory_space<vmem>>, %arg5: memref<6x32x8xf32, #tpu.memory_space<vmem>>, %arg6: memref<1x32xf32, #tpu.memory_space<vmem>>, %arg7: memref<17x144xf32, #tpu.memory_space<vmem>>, %arg8: memref<2x128xf32, #tpu.memory_space<vmem>>) attributes {dimension_semantics = [#tpu.dimension_semantics<parallel>], iteration_bounds = array<i64: 1>, scalar_prefetch = 0 : i64, scratch_operands = 0 : i64, tpu.core_type = #tpu.core_type<tc>, window_params = [{transform_indices = @transform_0, window_bounds = array<i64: 2, 10>}, {transform_indices = @transform_1, window_bounds = array<i64: 2, 12>}, {pipeline_mode = #tpu.pipeline_mode<synchronous>, transform_indices = @transform_2, window_bounds = array<i64: 110, 32>}, {pipeline_mode = #tpu.pipeline_mode<synchronous>, transform_indices = @transform_3, window_bounds = array<i64: 4, 32, 8>}, {pipeline_mode = #tpu.pipeline_mode<synchronous>, transform_indices = @transform_4, window_bounds = array<i64: 6, 32, 8>}, {pipeline_mode = #tpu.pipeline_mode<synchronous>, transform_indices = @transform_5, window_bounds = array<i64: 1, 32>}, {pipeline_mode = #tpu.pipeline_mode<synchronous>, transform_indices = @transform_6, window_bounds = array<i64: 17, 144>}, {transform_indices = @transform_7, window_bounds = array<i64: 2, 128>}]} {
    %c0 = arith.constant 0 : index
    %c0_0 = arith.constant 0 : index
    %0 = vector.load %arg3[%c0, %c0_0] : memref<110x32xf32, #tpu.memory_space<vmem>>, vector<110x32xf32>
    %c0_1 = arith.constant 0 : index
    %c0_2 = arith.constant 0 : index
    %1 = vector.load %arg1[%c0_1, %c0_2] : memref<2x10xi32, #tpu.memory_space<vmem>>, vector<2x10xi32>
    %2 = tpu.iota {dimensions = array<i32: 2>} : vector<2x10x110xi32>
    %3 = vector.shape_cast %1 : vector<2x10xi32> to vector<2x10x1xi32>
    %4 = vector.broadcast %3 : vector<2x10x1xi32> to vector<2x10x110xi32>
    %5 = arith.cmpi eq, %2, %4 : vector<2x10x110xi32>
    %6 = arith.extui %5 : vector<2x10x110xi1> to vector<2x10x110xi32>
    %7 = arith.sitofp %6 : vector<2x10x110xi32> to vector<2x10x110xf32>
    %8 = vector.shape_cast %7 : vector<2x10x110xf32> to vector<20x110xf32>
    %cst = arith.constant dense<0.000000e+00> : vector<20x32xf32>
    %9 = tpu.matmul %8, %0, %cst {dimension_numbers = #tpu.dot_dimension_numbers<[1], [0], [0], [1], [0, 0, 1, 1], [], []>} : vector<20x110xf32>, vector<110x32xf32>, vector<20x32xf32> -> vector<20x32xf32>
    %c0_3 = arith.constant 0 : index
    %c0_4 = arith.constant 0 : index
    %10 = vector.load %arg2[%c0_3, %c0_4] : memref<2x12xi32, #tpu.memory_space<vmem>>, vector<2x12xi32>
    %c50_i32 = arith.constant 50 : i32
    %11 = vector.broadcast %c50_i32 : i32 to vector<2x12xi32>
    %12 = arith.addi %10, %11 : vector<2x12xi32>
    %13 = tpu.iota {dimensions = array<i32: 2>} : vector<2x12x110xi32>
    %14 = vector.shape_cast %12 : vector<2x12xi32> to vector<2x12x1xi32>
    %15 = vector.broadcast %14 : vector<2x12x1xi32> to vector<2x12x110xi32>
    %16 = arith.cmpi eq, %13, %15 : vector<2x12x110xi32>
    %17 = arith.extui %16 : vector<2x12x110xi1> to vector<2x12x110xi32>
    %18 = arith.sitofp %17 : vector<2x12x110xi32> to vector<2x12x110xf32>
    %19 = vector.shape_cast %18 : vector<2x12x110xf32> to vector<24x110xf32>
    %cst_5 = arith.constant dense<0.000000e+00> : vector<24x32xf32>
    %20 = tpu.matmul %19, %0, %cst_5 {dimension_numbers = #tpu.dot_dimension_numbers<[1], [0], [0], [1], [0, 0, 1, 1], [], []>} : vector<24x110xf32>, vector<110x32xf32>, vector<24x32xf32> -> vector<24x32xf32>
    %c0_6 = arith.constant 0 : index
    %c0_7 = arith.constant 0 : index
    %21 = vector.load %arg6[%c0_6, %c0_7] : memref<1x32xf32, #tpu.memory_space<vmem>>, vector<1x32xf32>
    %22 = vector.extract_strided_slice %21 {offsets = [0, 0], sizes = [1, 8], strides = [1, 1]} : vector<1x32xf32> to vector<1x8xf32>
    %23 = vector.extract_strided_slice %21 {offsets = [0, 8], sizes = [1, 8], strides = [1, 1]} : vector<1x32xf32> to vector<1x8xf32>
    %24 = vector.shape_cast %9 : vector<20x32xf32> to vector<2x10x32xf32>
    %25 = vector.extract_strided_slice %24 {offsets = [0, 0, 0], sizes = [2, 9, 32], strides = [1, 1, 1]} : vector<2x10x32xf32> to vector<2x9x32xf32>
    %26 = vector.shape_cast %25 : vector<2x9x32xf32> to vector<18x32xf32>
    %c0_8 = arith.constant 0 : index
    %c0_9 = arith.constant 0 : index
    %c0_10 = arith.constant 0 : index
    %27 = vector.load %arg4[%c0_8, %c0_9, %c0_10] : memref<4x32x8xf32, #tpu.memory_space<vmem>>, vector<1x32x8xf32>
    %28 = vector.shape_cast %27 : vector<1x32x8xf32> to vector<32x8xf32>
    %cst_11 = arith.constant dense<0.000000e+00> : vector<18x8xf32>
    %29 = tpu.matmul %26, %28, %cst_11 {dimension_numbers = #tpu.dot_dimension_numbers<[1], [0], [0], [1], [0, 0, 1, 1], [], []>} : vector<18x32xf32>, vector<32x8xf32>, vector<18x8xf32> -> vector<18x8xf32>
    %30 = vector.extract_strided_slice %24 {offsets = [0, 1, 0], sizes = [2, 9, 32], strides = [1, 1, 1]} : vector<2x10x32xf32> to vector<2x9x32xf32>
    %31 = vector.shape_cast %30 : vector<2x9x32xf32> to vector<18x32xf32>
    %c1 = arith.constant 1 : index
    %c0_12 = arith.constant 0 : index
    %c0_13 = arith.constant 0 : index
    %32 = vector.load %arg4[%c1, %c0_12, %c0_13] : memref<4x32x8xf32, #tpu.memory_space<vmem>>, vector<1x32x8xf32>
    %33 = vector.shape_cast %32 : vector<1x32x8xf32> to vector<32x8xf32>
    %cst_14 = arith.constant dense<0.000000e+00> : vector<18x8xf32>
    %34 = tpu.matmul %31, %33, %cst_14 {dimension_numbers = #tpu.dot_dimension_numbers<[1], [0], [0], [1], [0, 0, 1, 1], [], []>} : vector<18x32xf32>, vector<32x8xf32>, vector<18x8xf32> -> vector<18x8xf32>
    %35 = arith.addf %29, %34 : vector<18x8xf32>
    %36 = vector.broadcast %22 : vector<1x8xf32> to vector<18x8xf32>
    %37 = arith.addf %35, %36 : vector<18x8xf32>
    %cst_15 = arith.constant 0.000000e+00 : f32
    %38 = vector.broadcast %cst_15 : f32 to vector<18x8xf32>
    %39 = arith.maximumf %37, %38 : vector<18x8xf32>
    %40 = vector.shape_cast %39 : vector<18x8xf32> to vector<2x9x8xf32>
    %cst_16 = arith.constant dense<0xFF800000> : vector<2x8xf32>
    %41 = vector.multi_reduction <maximumf>, %40, %cst_16 [1] : vector<2x9x8xf32> to vector<2x8xf32>
    %42 = vector.shape_cast %20 : vector<24x32xf32> to vector<2x12x32xf32>
    %43 = vector.extract_strided_slice %42 {offsets = [0, 0, 0], sizes = [2, 11, 32], strides = [1, 1, 1]} : vector<2x12x32xf32> to vector<2x11x32xf32>
    %44 = vector.shape_cast %43 : vector<2x11x32xf32> to vector<22x32xf32>
    %c2 = arith.constant 2 : index
    %c0_17 = arith.constant 0 : index
    %c0_18 = arith.constant 0 : index
    %45 = vector.load %arg4[%c2, %c0_17, %c0_18] : memref<4x32x8xf32, #tpu.memory_space<vmem>>, vector<1x32x8xf32>
    %46 = vector.shape_cast %45 : vector<1x32x8xf32> to vector<32x8xf32>
    %cst_19 = arith.constant dense<0.000000e+00> : vector<22x8xf32>
    %47 = tpu.matmul %44, %46, %cst_19 {dimension_numbers = #tpu.dot_dimension_numbers<[1], [0], [0], [1], [0, 0, 1, 1], [], []>} : vector<22x32xf32>, vector<32x8xf32>, vector<22x8xf32> -> vector<22x8xf32>
    %48 = vector.extract_strided_slice %42 {offsets = [0, 1, 0], sizes = [2, 11, 32], strides = [1, 1, 1]} : vector<2x12x32xf32> to vector<2x11x32xf32>
    %49 = vector.shape_cast %48 : vector<2x11x32xf32> to vector<22x32xf32>
    %c3 = arith.constant 3 : index
    %c0_20 = arith.constant 0 : index
    %c0_21 = arith.constant 0 : index
    %50 = vector.load %arg4[%c3, %c0_20, %c0_21] : memref<4x32x8xf32, #tpu.memory_space<vmem>>, vector<1x32x8xf32>
    %51 = vector.shape_cast %50 : vector<1x32x8xf32> to vector<32x8xf32>
    %cst_22 = arith.constant dense<0.000000e+00> : vector<22x8xf32>
    %52 = tpu.matmul %49, %51, %cst_22 {dimension_numbers = #tpu.dot_dimension_numbers<[1], [0], [0], [1], [0, 0, 1, 1], [], []>} : vector<22x32xf32>, vector<32x8xf32>, vector<22x8xf32> -> vector<22x8xf32>
    %53 = arith.addf %47, %52 : vector<22x8xf32>
    %54 = vector.broadcast %23 : vector<1x8xf32> to vector<22x8xf32>
    %55 = arith.addf %53, %54 : vector<22x8xf32>
    %cst_23 = arith.constant 0.000000e+00 : f32
    %56 = vector.broadcast %cst_23 : f32 to vector<22x8xf32>
    %57 = arith.maximumf %55, %56 : vector<22x8xf32>
    %58 = vector.shape_cast %57 : vector<22x8xf32> to vector<2x11x8xf32>
    %cst_24 = arith.constant dense<0xFF800000> : vector<2x8xf32>
    %59 = vector.multi_reduction <maximumf>, %58, %cst_24 [1] : vector<2x11x8xf32> to vector<2x8xf32>
    %60 = arith.maximumf %41, %59 : vector<2x8xf32>
    %61 = vector.extract_strided_slice %21 {offsets = [0, 16], sizes = [1, 8], strides = [1, 1]} : vector<1x32xf32> to vector<1x8xf32>
    %62 = vector.extract_strided_slice %21 {offsets = [0, 24], sizes = [1, 8], strides = [1, 1]} : vector<1x32xf32> to vector<1x8xf32>
    %63 = vector.shape_cast %9 : vector<20x32xf32> to vector<2x10x32xf32>
    %64 = vector.extract_strided_slice %63 {offsets = [0, 0, 0], sizes = [2, 8, 32], strides = [1, 1, 1]} : vector<2x10x32xf32> to vector<2x8x32xf32>
    %65 = vector.shape_cast %64 : vector<2x8x32xf32> to vector<16x32xf32>
    %c0_25 = arith.constant 0 : index
    %c0_26 = arith.constant 0 : index
    %c0_27 = arith.constant 0 : index
    %66 = vector.load %arg5[%c0_25, %c0_26, %c0_27] : memref<6x32x8xf32, #tpu.memory_space<vmem>>, vector<1x32x8xf32>
    %67 = vector.shape_cast %66 : vector<1x32x8xf32> to vector<32x8xf32>
    %cst_28 = arith.constant dense<0.000000e+00> : vector<16x8xf32>
    %68 = tpu.matmul %65, %67, %cst_28 {dimension_numbers = #tpu.dot_dimension_numbers<[1], [0], [0], [1], [0, 0, 1, 1], [], []>} : vector<16x32xf32>, vector<32x8xf32>, vector<16x8xf32> -> vector<16x8xf32>
    %69 = vector.extract_strided_slice %63 {offsets = [0, 1, 0], sizes = [2, 8, 32], strides = [1, 1, 1]} : vector<2x10x32xf32> to vector<2x8x32xf32>
    %70 = vector.shape_cast %69 : vector<2x8x32xf32> to vector<16x32xf32>
    %c1_29 = arith.constant 1 : index
    %c0_30 = arith.constant 0 : index
    %c0_31 = arith.constant 0 : index
    %71 = vector.load %arg5[%c1_29, %c0_30, %c0_31] : memref<6x32x8xf32, #tpu.memory_space<vmem>>, vector<1x32x8xf32>
    %72 = vector.shape_cast %71 : vector<1x32x8xf32> to vector<32x8xf32>
    %cst_32 = arith.constant dense<0.000000e+00> : vector<16x8xf32>
    %73 = tpu.matmul %70, %72, %cst_32 {dimension_numbers = #tpu.dot_dimension_numbers<[1], [0], [0], [1], [0, 0, 1, 1], [], []>} : vector<16x32xf32>, vector<32x8xf32>, vector<16x8xf32> -> vector<16x8xf32>
    %74 = arith.addf %68, %73 : vector<16x8xf32>
    %75 = vector.extract_strided_slice %63 {offsets = [0, 2, 0], sizes = [2, 8, 32], strides = [1, 1, 1]} : vector<2x10x32xf32> to vector<2x8x32xf32>
    %76 = vector.shape_cast %75 : vector<2x8x32xf32> to vector<16x32xf32>
    %c2_33 = arith.constant 2 : index
    %c0_34 = arith.constant 0 : index
    %c0_35 = arith.constant 0 : index
    %77 = vector.load %arg5[%c2_33, %c0_34, %c0_35] : memref<6x32x8xf32, #tpu.memory_space<vmem>>, vector<1x32x8xf32>
    %78 = vector.shape_cast %77 : vector<1x32x8xf32> to vector<32x8xf32>
    %cst_36 = arith.constant dense<0.000000e+00> : vector<16x8xf32>
    %79 = tpu.matmul %76, %78, %cst_36 {dimension_numbers = #tpu.dot_dimension_numbers<[1], [0], [0], [1], [0, 0, 1, 1], [], []>} : vector<16x32xf32>, vector<32x8xf32>, vector<16x8xf32> -> vector<16x8xf32>
    %80 = arith.addf %74, %79 : vector<16x8xf32>
    %81 = vector.broadcast %61 : vector<1x8xf32> to vector<16x8xf32>
    %82 = arith.addf %80, %81 : vector<16x8xf32>
    %cst_37 = arith.constant 0.000000e+00 : f32
    %83 = vector.broadcast %cst_37 : f32 to vector<16x8xf32>
    %84 = arith.maximumf %82, %83 : vector<16x8xf32>
    %85 = vector.shape_cast %84 : vector<16x8xf32> to vector<2x8x8xf32>
    %cst_38 = arith.constant dense<0xFF800000> : vector<2x8xf32>
    %86 = vector.multi_reduction <maximumf>, %85, %cst_38 [1] : vector<2x8x8xf32> to vector<2x8xf32>
    %87 = vector.shape_cast %20 : vector<24x32xf32> to vector<2x12x32xf32>
    %88 = vector.extract_strided_slice %87 {offsets = [0, 0, 0], sizes = [2, 10, 32], strides = [1, 1, 1]} : vector<2x12x32xf32> to vector<2x10x32xf32>
    %89 = vector.shape_cast %88 : vector<2x10x32xf32> to vector<20x32xf32>
    %c3_39 = arith.constant 3 : index
    %c0_40 = arith.constant 0 : index
    %c0_41 = arith.constant 0 : index
    %90 = vector.load %arg5[%c3_39, %c0_40, %c0_41] : memref<6x32x8xf32, #tpu.memory_space<vmem>>, vector<1x32x8xf32>
    %91 = vector.shape_cast %90 : vector<1x32x8xf32> to vector<32x8xf32>
    %cst_42 = arith.constant dense<0.000000e+00> : vector<20x8xf32>
    %92 = tpu.matmul %89, %91, %cst_42 {dimension_numbers = #tpu.dot_dimension_numbers<[1], [0], [0], [1], [0, 0, 1, 1], [], []>} : vector<20x32xf32>, vector<32x8xf32>, vector<20x8xf32> -> vector<20x8xf32>
    %93 = vector.extract_strided_slice %87 {offsets = [0, 1, 0], sizes = [2, 10, 32], strides = [1, 1, 1]} : vector<2x12x32xf32> to vector<2x10x32xf32>
    %94 = vector.shape_cast %93 : vector<2x10x32xf32> to vector<20x32xf32>
    %c4 = arith.constant 4 : index
    %c0_43 = arith.constant 0 : index
    %c0_44 = arith.constant 0 : index
    %95 = vector.load %arg5[%c4, %c0_43, %c0_44] : memref<6x32x8xf32, #tpu.memory_space<vmem>>, vector<1x32x8xf32>
    %96 = vector.shape_cast %95 : vector<1x32x8xf32> to vector<32x8xf32>
    %cst_45 = arith.constant dense<0.000000e+00> : vector<20x8xf32>
    %97 = tpu.matmul %94, %96, %cst_45 {dimension_numbers = #tpu.dot_dimension_numbers<[1], [0], [0], [1], [0, 0, 1, 1], [], []>} : vector<20x32xf32>, vector<32x8xf32>, vector<20x8xf32> -> vector<20x8xf32>
    %98 = arith.addf %92, %97 : vector<20x8xf32>
    %99 = vector.extract_strided_slice %87 {offsets = [0, 2, 0], sizes = [2, 10, 32], strides = [1, 1, 1]} : vector<2x12x32xf32> to vector<2x10x32xf32>
    %100 = vector.shape_cast %99 : vector<2x10x32xf32> to vector<20x32xf32>
    %c5 = arith.constant 5 : index
    %c0_46 = arith.constant 0 : index
    %c0_47 = arith.constant 0 : index
    %101 = vector.load %arg5[%c5, %c0_46, %c0_47] : memref<6x32x8xf32, #tpu.memory_space<vmem>>, vector<1x32x8xf32>
    %102 = vector.shape_cast %101 : vector<1x32x8xf32> to vector<32x8xf32>
    %cst_48 = arith.constant dense<0.000000e+00> : vector<20x8xf32>
    %103 = tpu.matmul %100, %102, %cst_48 {dimension_numbers = #tpu.dot_dimension_numbers<[1], [0], [0], [1], [0, 0, 1, 1], [], []>} : vector<20x32xf32>, vector<32x8xf32>, vector<20x8xf32> -> vector<20x8xf32>
    %104 = arith.addf %98, %103 : vector<20x8xf32>
    %105 = vector.broadcast %62 : vector<1x8xf32> to vector<20x8xf32>
    %106 = arith.addf %104, %105 : vector<20x8xf32>
    %cst_49 = arith.constant 0.000000e+00 : f32
    %107 = vector.broadcast %cst_49 : f32 to vector<20x8xf32>
    %108 = arith.maximumf %106, %107 : vector<20x8xf32>
    %109 = vector.shape_cast %108 : vector<20x8xf32> to vector<2x10x8xf32>
    %cst_50 = arith.constant dense<0xFF800000> : vector<2x8xf32>
    %110 = vector.multi_reduction <maximumf>, %109, %cst_50 [1] : vector<2x10x8xf32> to vector<2x8xf32>
    %111 = arith.maximumf %86, %110 : vector<2x8xf32>
    %112 = tpu.concatenate %60, %111 in 1 : vector<2x8xf32>, vector<2x8xf32> -> vector<2x16xf32>
    %c0_51 = arith.constant 0 : index
    %c0_52 = arith.constant 0 : index
    %113 = vector.load %arg7[%c0_51, %c0_52] : memref<17x144xf32, #tpu.memory_space<vmem>>, vector<17x144xf32>
    %114 = vector.extract_strided_slice %113 {offsets = [0, 0], sizes = [16, 16], strides = [1, 1]} : vector<17x144xf32> to vector<16x16xf32>
    %115 = vector.extract_strided_slice %113 {offsets = [16, 0], sizes = [1, 16], strides = [1, 1]} : vector<17x144xf32> to vector<1x16xf32>
    %116 = vector.extract_strided_slice %113 {offsets = [0, 16], sizes = [16, 128], strides = [1, 1]} : vector<17x144xf32> to vector<16x128xf32>
    %117 = vector.extract_strided_slice %113 {offsets = [16, 16], sizes = [1, 128], strides = [1, 1]} : vector<17x144xf32> to vector<1x128xf32>
    %cst_53 = arith.constant dense<0.000000e+00> : vector<2x16xf32>
    %118 = tpu.matmul %112, %114, %cst_53 {dimension_numbers = #tpu.dot_dimension_numbers<[1], [0], [0], [1], [0, 0, 1, 1], [], []>} : vector<2x16xf32>, vector<16x16xf32>, vector<2x16xf32> -> vector<2x16xf32>
    %119 = vector.broadcast %115 : vector<1x16xf32> to vector<2x16xf32>
    %120 = arith.addf %118, %119 : vector<2x16xf32>
    %cst_54 = arith.constant 0.000000e+00 : f32
    %121 = vector.broadcast %cst_54 : f32 to vector<2x16xf32>
    %122 = arith.subf %121, %120 : vector<2x16xf32>
    %123 = math.exp %122 : vector<2x16xf32>
    %cst_55 = arith.constant 1.000000e+00 : f32
    %124 = vector.broadcast %cst_55 : f32 to vector<2x16xf32>
    %125 = arith.addf %124, %123 : vector<2x16xf32>
    %cst_56 = arith.constant 1.000000e+00 : f32
    %126 = vector.broadcast %cst_56 : f32 to vector<2x16xf32>
    %127 = arith.divf %126, %125 : vector<2x16xf32>
    %cst_57 = arith.constant 0.000000e+00 : f32
    %128 = vector.broadcast %cst_57 : f32 to vector<2x16xf32>
    %129 = arith.maximumf %120, %128 : vector<2x16xf32>
    %130 = arith.mulf %127, %129 : vector<2x16xf32>
    %cst_58 = arith.constant 1.000000e+00 : f32
    %131 = vector.broadcast %cst_58 : f32 to vector<2x16xf32>
    %132 = arith.subf %131, %127 : vector<2x16xf32>
    %133 = arith.mulf %132, %112 : vector<2x16xf32>
    %134 = arith.addf %130, %133 : vector<2x16xf32>
    %cst_59 = arith.constant dense<0.000000e+00> : vector<2x128xf32>
    %135 = tpu.matmul %134, %116, %cst_59 {dimension_numbers = #tpu.dot_dimension_numbers<[1], [0], [0], [1], [0, 0, 1, 1], [], []>} : vector<2x16xf32>, vector<16x128xf32>, vector<2x128xf32> -> vector<2x128xf32>
    %136 = vector.broadcast %117 : vector<1x128xf32> to vector<2x128xf32>
    %137 = arith.addf %135, %136 : vector<2x128xf32>
    %c0_60 = arith.constant 0 : index
    %c0_61 = arith.constant 0 : index
    %138 = vector.load %arg8[%c0_60, %c0_61] : memref<2x128xf32, #tpu.memory_space<vmem>>, vector<2x128xf32>
    tpu.vector_store %arg8[%c0_60, %c0_61], %137 {strides = array<i32>} : memref<2x128xf32, #tpu.memory_space<vmem>>, vector<2x128xf32>,
    return
  }
  func.func @transform_0(%arg0: i32) -> (i32, i32) {
    %c0_i32 = arith.constant 0 : i32
    %c0_i32_0 = arith.constant 0 : i32
    return %arg0, %c0_i32 : i32, i32
  }
  func.func @transform_1(%arg0: i32) -> (i32, i32) {
    %c0_i32 = arith.constant 0 : i32
    %c0_i32_0 = arith.constant 0 : i32
    return %arg0, %c0_i32 : i32, i32
  }
  func.func @transform_2(%arg0: i32) -> (i32, i32) {
    %c0_i32 = arith.constant 0 : i32
    %c0_i32_0 = arith.constant 0 : i32
    %c0_i32_1 = arith.constant 0 : i32
    return %c0_i32, %c0_i32_0 : i32, i32
  }
  func.func @transform_3(%arg0: i32) -> (i32, i32, i32) {
    %c0_i32 = arith.constant 0 : i32
    %c0_i32_0 = arith.constant 0 : i32
    %c0_i32_1 = arith.constant 0 : i32
    %c0_i32_2 = arith.constant 0 : i32
    return %c0_i32, %c0_i32_0, %c0_i32_1 : i32, i32, i32
  }
  func.func @transform_4(%arg0: i32) -> (i32, i32, i32) {
    %c0_i32 = arith.constant 0 : i32
    %c0_i32_0 = arith.constant 0 : i32
    %c0_i32_1 = arith.constant 0 : i32
    %c0_i32_2 = arith.constant 0 : i32
    return %c0_i32, %c0_i32_0, %c0_i32_1 : i32, i32, i32
  }
  func.func @transform_5(%arg0: i32) -> (i32, i32) {
    %c0_i32 = arith.constant 0 : i32
    %c0_i32_0 = arith.constant 0 : i32
    %c0_i32_1 = arith.constant 0 : i32
    return %c0_i32, %c0_i32_0 : i32, i32
  }
  func.func @transform_6(%arg0: i32) -> (i32, i32) {
    %c0_i32 = arith.constant 0 : i32
    %c0_i32_0 = arith.constant 0 : i32
    %c0_i32_1 = arith.constant 0 : i32
    return %c0_i32, %c0_i32_0 : i32, i32
  }
  func.func @transform_7(%arg0: i32) -> (i32, i32) {
    %c0_i32 = arith.constant 0 : i32
    %c0_i32_0 = arith.constant 0 : i32
    return %arg0, %c0_i32 : i32, i32
  }
}

</mosaic_0001>

<bundles_post_ra>
// kernel: tpu_custom_call.1
= control target key start
LH: loop header
LB: loop body
LE: loop exit
PB: predicated region body
PF: predicated region fallthrough
CT: control target
= control target key end

     0   :  { %v42_v0 = vlaneseq  ;;  %vm119_vm0 = vcmask 1045504   ;;  %s2371_s0 = inlined_call_operand.vmem [shape: s32[2,10], index: 0, kind: input, shape index: {}]   ;;  %s2372_s1 = inlined_call_operand.vmem [shape: s32[2,12], index: 1, kind: input, shape index: {}]   ;;  %s2373_s2 = inlined_call_operand.vmem [shape: f32[110,32], index: 2, kind: input, shape index: {}]   ;;  %s2374_s3 = inlined_call_operand.vmem [shape: f32[4,32,8], index: 3, kind: input, shape index: {}]   ;;  %s2375_s4 = inlined_call_operand.vmem [shape: f32[6,32,8], index: 4, kind: input, shape index: {}]   ;;  %s2376_s5 = inlined_call_operand.vmem [shape: f32[1,32], index: 5, kind: input, shape index: {}]   ;;  %s2377_s6 = inlined_call_operand.vmem [shape: f32[17,144], index: 6, kind: input, shape index: {}]   ;;  %s2378_s7 = inlined_call_operand.hbm [shape: f32[2,128], index: 7, kind: output, shape index: {}]  }
   0x1   :  { %v40_v1 = vld [vmem:[%s2373_s2 + $0x68] sm:$0x3f]  ;;  %v39_v3 = vld [vmem:[%s2373_s2 + $0x60] sm:$0xff]  ;;  %v38_v6 = vld [vmem:[%s2373_s2 + $0x58] sm:$0xff] }
   0x2   :  { %v46_v2 = vshrl.u32 %v42_v0, 7  ;;  %1555 = vmatpush.msk.msra.mxu0 %vm119_vm0, %v40_v1  ;;  %1563 = vmatpush.msk.msra.mxu1 %vm119_vm0, %v40_v1  ;;  %v149_v4 = vld [vmem:[%s2372_s1] sm:$0x3] }
   0x3   :  { %v41_v7 = vld [vmem:[%s2371_s0] sm:$0x3] }
   0x4   :  { %1644 = vset.pattern.permute.xlu0 %v46_v2  ;;  %v53_v5 = vadd.s32 8, %v46_v2  ;;  %1646 = vset.pattern.permute.xlu2 %v46_v2 }
   0x5   :  { %126 = vmatpush.msra.mxu0 %v39_v3  ;;  %218 = vmatpush.msra.mxu1 %v39_v3 }
   0x6   :  { %12 = vsyncpa [#allocation3], 0  ;;  %1645 = vset.pattern.permute.xlu1 %v53_v5  ;;  %v150_v8 = vadd.s32 50, %v149_v4  ;;  %v37_v9 = vld [vmem:[%s2373_s2 + $0x50] sm:$0xff]  ;;  %v44_v10 = vperm.slane %v41_v7, 0  ;;  %v36_v12 = vld [vmem:[%s2373_s2 + $0x48] sm:$0xff] }
   0x7   :  { %127 = vmatpush.msra.mxu0 %v38_v6  ;;  %219 = vmatpush.msra.mxu1 %v38_v6  ;;  %v35_v13 = vld [vmem:[%s2373_s2 + $0x40] sm:$0xff]  ;;  %v34_v14 = vld [vmem:[%s2373_s2 + $0x38] sm:$0xff]  ;;  %v57_v15 = vperm.slane %v41_v7, 1  ;;  %v33_v17 = vld [vmem:[%s2373_s2 + $0x30] sm:$0xff]  ;;  %v43_v24 = vand.u32 127, %v42_v0  ;;  %v1692_v27 = vmov 0.0  }
   0x8   :  { %v151_v11 = vperm.slane %v150_v8, 0  ;;  %v164_v16 = vperm.slane %v150_v8, 1  ;;  %v32_v18 = vld [vmem:[%s2373_s2 + $0x28] sm:$0xff]  ;;  %v31_v19 = vld [vmem:[%s2373_s2 + $0x20] sm:$0xff]  ;;  %v30_v20 = vld [vmem:[%s2373_s2 + $0x18] sm:$0xff]  ;;  %vm112_vm6 = vcmask 900096  }
   0x9   :  { %128 = vmatpush.msra.mxu0 %v37_v9  ;;  %220 = vmatpush.msra.mxu1 %v37_v9  ;;  %v29_v21 = vld [vmem:[%s2373_s2 + $0x10] sm:$0xff]  ;;  %v28_v22 = vld [vmem:[%s2373_s2 + $0x8] sm:$0xff]  ;;  %v27_v23 = vld [vmem:[%s2373_s2] sm:$0xff]  ;;  %vm419_vm10 = vcmask 261120   ;;  %vm285_vm11 = vcmask 1041409   ;;  %vm287_vm12 = vcmask 1043459  }
   0xa   :  { %vm279_vm13 = vcmask 1040384   ;;  %vm281_vm14 = vcmask 1042434   ;;  %vm289_vm15 = vcmask 1042433   ;;  %vm283_vm0 = vcmask 1041408   ;;  %s1695_s21 = smov 104   ;;  %s1696_s0 = smov 8  }
   0xb   :  { %129 = vmatpush.msra.mxu0 %v36_v12  ;;  %221 = vmatpush.msra.mxu1 %v36_v12  ;;  %s1542_s22 = sshll.u32 %s2378_s7, 4  ;;  %s1543_s22 = int_to_ptr.hbm [resolvable:$true] %s1542_s22 }
   0xc   :  { %49 = vperm.xlu0 %1644, %v44_v10   ;;  %156 = vperm.xlu2 %1646, %v151_v11  }
   0xd   :  { %130 = vmatpush.msra.mxu0 %v35_v13  ;;  %222 = vmatpush.msra.mxu1 %v35_v13 }
   0xe   :  { %55 = vperm.xlu1 %1645, %v44_v10  }
   0xf   :  { %131 = vmatpush.msra.mxu0 %v34_v14  ;;  %223 = vmatpush.msra.mxu1 %v34_v14  ;;  %v1570_v14 = vld [vmem:[%s2374_s3 + $0x38] sm:$0xff] }
  0x10   :  { %438 = vmatpush.msra.mxu2 %v1570_v14 }
  0x11   :  { %132 = vmatpush.msra.mxu0 %v33_v17  ;;  %224 = vmatpush.msra.mxu1 %v33_v17 }
  0x13   :  { %133 = vmatpush.msra.mxu0 %v32_v18  ;;  %225 = vmatpush.msra.mxu1 %v32_v18 }
  0x14   :  { %62 = vperm.xlu0 %1644, %v57_v15   ;;  %1647 = vset.pattern.permute.xlu2 %v53_v5 }
  0x15   :  { %134 = vmatpush.msra.mxu0 %v31_v19  ;;  %226 = vmatpush.msra.mxu1 %v31_v19 }
  0x16   :  { %68 = vperm.xlu1 %1645, %v57_v15  }
  0x17   :  { %135 = vmatpush.msra.mxu0 %v30_v20  ;;  %227 = vmatpush.msra.mxu1 %v30_v20 }
  0x19   :  { %136 = vmatpush.msra.mxu0 %v29_v21  ;;  %228 = vmatpush.msra.mxu1 %v29_v21  ;;  %v1569_v21 = vld [vmem:[%s2374_s3 + $0x30] sm:$0xff] }
  0x1a   :  { %439 = vmatpush.msra.mxu2 %v1569_v21 }
  0x1b   :  { %137 = vmatpush.msra.mxu0 %v28_v22  ;;  %229 = vmatpush.msra.mxu1 %v28_v22  ;;  %v1568_v22 = vld [vmem:[%s2374_s3 + $0x28] sm:$0xff] }
  0x1c   :  { %169 = vperm.xlu0 %1644, %v164_v16   ;;  %162 = vperm.xlu2 %1647, %v151_v11  }
  0x1d   :  { %138 = vmatpush.msra.mxu0 %v27_v23  ;;  %230 = vmatpush.msra.mxu1 %v27_v23  ;;  %v1567_v23 = vld [vmem:[%s2374_s3 + $0x20] sm:$0xff] }
  0x1e   :  { %175 = vperm.xlu1 %1645, %v164_v16   ;;  %440 = vmatpush.msra.mxu2 %v1568_v22 }
  0x20   :  { %441 = vmatpush.msra.mxu2 %v1567_v23 }
  0x24   :  { %1658 = vset.pattern.permute.xlu0 %v53_v5 }
  0x66   :  { %v157_v25 = vpop.permute.xlu2 %156 }
  0x67   :  { %vm177_vm7 = vcmp.eq.s32.totalorder %v43_v24, %v157_v25  ;;  %v350_v25 = vld [vmem:[%s2374_s3 + $0x18] sm:$0xff] }
  0x68   :  { %v1559_v45 = vsel %vm177_vm7, 1.0, %v1692_v27  ;;  %498 = vmatpush.msra.mxu3 %v350_v25  ;;  %vm911_vm7 = vcmask 1046534  }
  0x69   :  { %v193_v50 = vrot.slane %v1559_v45, 4 }
  0x76   :  { %v163_v35 = vpop.permute.xlu2 %162 }
  0x77   :  { %vm178_vm5 = vcmp.eq.s32.totalorder %v43_v24, %v163_v35 }
  0x78   :  { %v1560_v43 = vsel %vm178_vm5, 1.0, %v1692_v27  ;;  %vm909_vm5 = vcmask 1044484  }
  0x7e   :  { %v50_v26 = vpop.permute.xlu0 %49 }
  0x7f   :  { %vm70_vm1 = vcmp.eq.s32.totalorder %v43_v24, %v50_v26  ;;  %v349_v26 = vld [vmem:[%s2374_s3 + $0x10] sm:$0xff] }
  0x80   :  { %v1551_v28 = vsel %vm70_vm1, 1.0, %v1692_v27  ;;  %v56_v29 = vpop.permute.xlu1 %55  ;;  %499 = vmatpush.msra.mxu3 %v349_v26  ;;  %vm572_vm1 = vcmask 64512  }
  0x81   :  { %v86_v30 = vrot.slane %v1551_v28, 2  ;;  %v87_v31 = vrot.slane %v1551_v28, 4  ;;  %v88_v32 = vrot.slane %v1551_v28, 6  ;;  %92 = vst [vmem:[#allocation1] ss:$4 sm:$0xff] %v1551_v28  ;;  %vm71_vm2 = vcmp.eq.s32.totalorder %v43_v24, %v56_v29  ;;  %v347_v28 = vld [vmem:[%s2374_s3] sm:$0xff] }
  0x82   :  { %v1552_v33 = vsel %vm71_vm2, 1.0, %v1692_v27  ;;  %vm574_vm2 = vcmask 57344  }
  0x83   :  { %96 = vst [vmem:[#allocation1 + $0x2] ss:$4 sm:$0xff] %v87_v31 }
  0x84   :  { %98 = vst [vmem:[#allocation1 + $0x3] ss:$4 sm:$0xff] %v88_v32 }
  0x85   :  { %94 = vst [vmem:[#allocation1 + $0x1] ss:$4 sm:$0xff] %v86_v30 }
  0x86   :  { %100 = vst [vmem:[#allocation1 + $0x20] ss:$4 sm:$0xff] %v1552_v33  ;;  %v63_v34 = vpop.permute.xlu0 %62 }
  0x87   :  { %vm72_vm3 = vcmp.eq.s32.totalorder %v43_v24, %v63_v34 }
  0x88   :  { %v1553_v36 = vsel %vm72_vm3, 1.0, %v1692_v27  ;;  %v69_v37 = vpop.permute.xlu1 %68  ;;  %vm884_vm3 = vcmask 59392  }
  0x89   :  { %v89_v38 = vrot.slane %v1553_v36, 2  ;;  %v90_v39 = vrot.slane %v1553_v36, 4  ;;  %102 = vst [vmem:[#allocation1 + $0x21] ss:$4 sm:$0xff] %v1553_v36  ;;  %vm73_vm4 = vcmp.eq.s32.totalorder %v43_v24, %v69_v37  ;;  %v91_v40 = vrot.slane %v1553_v36, 6 }
  0x8a   :  { %v1554_v41 = vsel %vm73_vm4, 1.0, %v1692_v27  ;;  %vm908_vm4 = vmor %vm279_vm13, %vm281_vm14 }
  0x8b   :  { %104 = vst [vmem:[#allocation1 + $0x22] ss:$4 sm:$0xff] %v89_v38 }
  0x8c   :  { %106 = vst [vmem:[#allocation1 + $0x23] ss:$4 sm:$0xff] %v90_v39  ;;  %v107_v42 = vld.sshfl [vmem:[#allocation1] sm:$0xff pattern:$0x73625140] }
  0x8d   :  { %110 = vst [vmem:[#allocation1 + $0x1] ss:$4 sm:$0xff] %v1554_v41  ;;  %1556 = vmatmul.msk.f32.vlgmr.msra.gmra.mxu0 %vm112_vm6, %v107_v42 }
  0x8e   :  { %109 = vst [vmem:[#allocation1] ss:$4 sm:$0xff] %v91_v40  ;;  %v170_v44 = vpop.permute.xlu0 %169 }
  0x8f   :  { %199 = vst [vmem:[#allocation1 + $0x10] ss:$2 sm:$0xff] %v1560_v43  ;;  %vm179_vm8 = vcmp.eq.s32.totalorder %v43_v24, %v170_v44 }
  0x90   :  { %v1561_v46 = vsel %vm179_vm8, 1.0, %v1692_v27  ;;  %v176_v47 = vpop.permute.xlu1 %175 }
  0x91   :  { %v194_v48 = vrot.slane %v1561_v46, 4  ;;  %201 = vst [vmem:[#allocation1 + $0x11] ss:$2 sm:$0xff] %v1561_v46  ;;  %vm180_vm9 = vcmp.eq.s32.totalorder %v43_v24, %v176_v47 }
  0x92   :  { %v1562_v49 = vsel %vm180_vm9, 1.0, %v1692_v27  ;;  %v348_v27 = vld [vmem:[%s2374_s3 + $0x8] sm:$0xff]  ;;  %vm1111_vm9 = vcmask 1043458  }
  0x93   :  { %v108_v51 = vld.sshfl [vmem:[#allocation1 + $0x20] sm:$0xff pattern:$0x73625140]  ;;  %500 = vmatpush.msra.mxu3 %v348_v27 }
  0x94   :  { %203 = vst [vmem:[#allocation1 + $0x20] ss:$2 sm:$0xff] %v194_v48 }
  0x95   :  { %1557 = vmatmul.msk.f32.gmra.mxu0 %vm112_vm6, %v108_v51  ;;  %205 = vst [vmem:[#allocation1 + $0x21] ss:$2 sm:$0xff] %v1562_v49  ;;  %v111_v52 = vld.sshfl [vmem:[#allocation1] sm:$0xff pattern:$0x73625140]  ;;  %501 = vmatpush.msra.mxu3 %v347_v28 }
  0x96   :  { %195 = vst [vmem:[#allocation1] ss:$2 sm:$0xff] %v1559_v45 }
  0x97   :  { %197 = vst [vmem:[#allocation1 + $0x1] ss:$2 sm:$0xff] %v193_v50 }
  0x98   :  { %v207_v54 = vld.sshfl [vmem:[#allocation1 + $0x10] sm:$0xff pattern:$0x75316420] }
  0x9c   :  { %v208_v55 = vld.sshfl [vmem:[#allocation1 + $0x20] sm:$0xff pattern:$0x75316420] }
  0x9d   :  { %1558 = vmatmul.msk.f32.gmra.mxu0 %vm112_vm6, %v111_v52 }
  0x9e   :  { %v206_v53 = vld.sshfl [vmem:[#allocation1] sm:$0xff pattern:$0x75316420] }
  0x9f   :  { %1564 = vmatmul.msk.f32.vlgmr.msra.gmra.mxu1 %vm112_vm6, %v206_v53 }
  0xa7   :  { %1565 = vmatmul.msk.f32.gmra.mxu1 %vm112_vm6, %v207_v54 }
  0xaf   :  { %1566 = vmatmul.msk.f32.gmra.mxu1 %vm112_vm6, %v208_v55  ;;  %vm910_vm6 = vmor %vm908_vm4, %vm909_vm5 }
  0xb0   :  { %vm2118_vm8 = vmor %vm910_vm6, %vm911_vm7 }
 0x10a   :  { %v1794_v56 = vpop.f32.mrf.mxu0 }
 0x10b   :  { %v1797_v57 = vrot.slane %v1794_v56, 2  ;;  %v1800_v58 = vrot.slane %v1794_v56, 4  ;;  %v1803_v59 = vrot.slane %v1794_v56, 6  ;;  %351 = vst [vmem:[#allocation1] sm:$0xff] %v1794_v56  ;;  %v252_v29 = vrot.slane %v1794_v56, 1 }
 0x10c   :  { %v253_v30 = vrot.slane %v1794_v56, 3 }
 0x10d   :  { %352 = vst [vmem:[#allocation1 + $0x10] sm:$0xff] %v1797_v57  ;;  %v254_v32 = vrot.slane %v1797_v57, 1  ;;  %v255_v33 = vrot.slane %v1797_v57, 2  ;;  %v256_v34 = vrot.slane %v1797_v57, 3  ;;  %v257_v35 = vrot.slane %v1800_v58, 1 }
 0x10e   :  { %353 = vst [vmem:[#allocation1 + $0x20] sm:$0xff] %v1800_v58  ;;  %v258_v36 = vrot.slane %v1800_v58, 2  ;;  %v259_v37 = vrot.slane %v1800_v58, 3  ;;  %v286_v38 = vsel %vm285_vm11, %v1794_v56, %v252_v29  ;;  %v288_v39 = vsel %vm287_vm12, %v1797_v57, %v253_v30 }
 0x10f   :  { %354 = vst [vmem:[#allocation1 + $0x30] sm:$0xff] %v1803_v59  ;;  %v260_v40 = vrot.slane %v1803_v59, 1  ;;  %v261_v41 = vrot.slane %v1803_v59, 2  ;;  %v262_v42 = vrot.slane %v1803_v59, 3  ;;  %v295_v43 = vsel %vm285_vm11, %v1797_v57, %v254_v32 }
 0x110   :  { %v296_v44 = vsel %vm287_vm12, %v255_v33, %v256_v34  ;;  %v280_v45 = vsel %vm279_vm13, %v1794_v56, %v252_v29  ;;  %v282_v46 = vsel %vm281_vm14, %v1797_v57, %v253_v30  ;;  %v290_v47 = vsel %vm289_vm15, %v286_v38, %v288_v39 }
 0x111   :  { %v302_v48 = vsel %vm285_vm11, %v1800_v58, %v257_v35  ;;  %v303_v49 = vsel %vm287_vm12, %v258_v36, %v259_v37  ;;  %v292_v50 = vsel %vm279_vm13, %v1797_v57, %v254_v32  ;;  %v293_v51 = vsel %vm281_vm14, %v255_v33, %v256_v34 }
 0x112   :  { %v1809_v60 = vpop.f32.mrf.mxu0  ;;  %v356_v61 = vld [vmem:[#allocation1 + $0x1] ss:$2 sm:$0xff]  ;;  %v297_v52 = vsel %vm289_vm15, %v295_v43, %v296_v44  ;;  %v284_v53 = vsel %vm283_vm0, %v280_v45, %v282_v46  ;;  %v291_v54 = vrot.slane %v290_v47, 1  ;;  %v309_v55 = vsel %vm285_vm11, %v1803_v59, %v260_v40 }
 0x113   :  { %369 = vst [vmem:[#allocation1] sm:$0xff] %v1809_v60  ;;  %v1813_v0 = vrot.slane %v1809_v60, 2  ;;  %v1816_v1 = vrot.slane %v1809_v60, 4  ;;  %v1819_v4 = vrot.slane %v1809_v60, 6 }
 0x114   :  { %v358_v62 = vld [vmem:[#allocation1 + $0x10] ss:$2 sm:$0xff]  ;;  %v360_v63 = vld [vmem:[#allocation1 + $0x11] ss:$2 sm:$0xff] }
 0x115   :  { %v362_v2 = vld [vmem:[#allocation1 + $0x20] ss:$2 sm:$0xff]  ;;  %v364_v3 = vld [vmem:[#allocation1 + $0x21] ss:$2 sm:$0xff]  ;;  %372 = vst [vmem:[#allocation1 + $0x10] sm:$0xff] %v1813_v0  ;;  %v268_v23 = vrot.slane %v1816_v1, 1 }
 0x116   :  { %v366_v5 = vld [vmem:[#allocation1 + $0x30] ss:$2 sm:$0xff]  ;;  %v368_v6 = vld [vmem:[#allocation1 + $0x31] ss:$2 sm:$0xff]  ;;  %373 = vst [vmem:[#allocation1 + $0x20] sm:$0xff] %v1816_v1  ;;  %v270_v25 = vrot.slane %v1816_v1, 3 }
 0x117   :  { %374 = vst [vmem:[#allocation1 + $0x30] sm:$0xff] %v1819_v4  ;;  %v271_v26 = vrot.slane %v1819_v4, 1  ;;  %v272_v27 = vrot.slane %v1819_v4, 2  ;;  %v273_v28 = vrot.slane %v1819_v4, 3  ;;  %v323_v45 = vsel %vm279_vm13, %v1816_v1, %v268_v23 }
 0x11a   :  { %v370_v7 = vld [vmem:[#allocation1] ss:$2 sm:$0xff]  ;;  %v1823_v8 = vpop.f32.mrf.mxu0  ;;  %v371_v9 = vld [vmem:[#allocation1 + $0x1] ss:$2 sm:$0xff] }
 0x11b   :  { %380 = vst [vmem:[#allocation1] sm:$0xff] %v1823_v8  ;;  %v1828_v11 = vrot.slane %v1823_v8, 2  ;;  %v274_v21 = vrot.slane %v1823_v8, 1  ;;  %v275_v22 = vrot.slane %v1823_v8, 3 }
 0x11c   :  { %v375_v10 = vld [vmem:[#allocation1 + $0x11] ss:$2 sm:$0xff] }
 0x11d   :  { %381 = vst [vmem:[#allocation1 + $0x10] sm:$0xff] %v1828_v11  ;;  %v376_v12 = vld [vmem:[#allocation1 + $0x20] ss:$2 sm:$0xff]  ;;  %v377_v13 = vld [vmem:[#allocation1 + $0x21] ss:$2 sm:$0xff]  ;;  %v337_v33 = vsel %vm279_vm13, %v1823_v8, %v274_v21  ;;  %v338_v34 = vsel %vm281_vm14, %v1828_v11, %v275_v22 }
 0x11e   :  { %v378_v15 = vld [vmem:[#allocation1 + $0x30] ss:$2 sm:$0xff]  ;;  %v379_v16 = vld [vmem:[#allocation1 + $0x31] ss:$2 sm:$0xff]  ;;  %v339_v43 = vsel %vm283_vm0, %v337_v33, %v338_v34 }
 0x122   :  { %v382_v17 = vld [vmem:[#allocation1] ss:$2 sm:$0xff]  ;;  %v383_v18 = vld [vmem:[#allocation1 + $0x1] ss:$2 sm:$0xff] }
 0x124   :  { %v384_v19 = vld [vmem:[#allocation1 + $0x10] ss:$2 sm:$0xff]  ;;  %v385_v20 = vld [vmem:[#allocation1 + $0x11] ss:$2 sm:$0xff] }
 0x125   :  { %391 = vst [vmem:[#allocation1] ss:$9 sm:$0xff] %v356_v61  ;;  %v310_v61 = vsel %vm287_vm12, %v261_v41, %v262_v42 }
 0x126   :  { %393 = vst [vmem:[#allocation1 + $0x1] ss:$9 sm:$0xff] %v358_v62 }
 0x127   :  { %395 = vst [vmem:[#allocation1 + $0x2] ss:$9 sm:$0xff] %v360_v63  ;;  %v299_v63 = vsel %vm279_vm13, %v1800_v58, %v257_v35  ;;  %v326_v35 = vsel %vm285_vm11, %v1816_v1, %v268_v23 }
 0x128   :  { %397 = vst [vmem:[#allocation1 + $0x3] ss:$9 sm:$0xff] %v362_v2  ;;  %v300_v2 = vsel %vm281_vm14, %v258_v36, %v259_v37 }
 0x129   :  { %399 = vst [vmem:[#allocation1 + $0x4] ss:$9 sm:$0xff] %v364_v3  ;;  %v304_v3 = vsel %vm289_vm15, %v302_v48, %v303_v49 }
 0x12a   :  { %401 = vst [vmem:[#allocation1 + $0x5] ss:$9 sm:$0xff] %v366_v5  ;;  %v294_v5 = vsel %vm283_vm0, %v292_v50, %v293_v51  ;;  %v330_v50 = vsel %vm279_vm13, %v1819_v4, %v271_v26  ;;  %v331_v51 = vsel %vm281_vm14, %v272_v27, %v273_v28 }
 0x12b   :  { %403 = vst [vmem:[#allocation1 + $0x6] ss:$9 sm:$0xff] %v368_v6  ;;  %v298_v6 = vrot.slane %v297_v52, 1 }
 0x12c   :  { %405 = vst [vmem:[#allocation1 + $0x7] ss:$9 sm:$0xff] %v370_v7  ;;  %v306_v7 = vsel %vm279_vm13, %v1803_v59, %v260_v40 }
 0x133   :  { %v406_v24 = vld [vmem:[#allocation1] sm:$0xff] }
 0x134   :  { %407 = vst [vmem:[#allocation1] ss:$9 sm:$0xff] %v371_v9  ;;  %1571 = vmatmul.msk.f32.vlgmr.msra.gmra.mxu2 %vm419_vm10, %v406_v24  ;;  %v307_v9 = vsel %vm281_vm14, %v261_v41, %v262_v42  ;;  %v269_v24 = vrot.slane %v1816_v1, 2  ;;  %v333_v41 = vsel %vm285_vm11, %v1819_v4, %v271_v26  ;;  %v334_v42 = vsel %vm287_vm12, %v272_v27, %v273_v28 }
 0x135   :  { %408 = vst [vmem:[#allocation1 + $0x1] ss:$9 sm:$0xff] %v375_v10  ;;  %v311_v10 = vsel %vm289_vm15, %v309_v55, %v310_v61  ;;  %v308_v14 = vsel %vm283_vm0, %v306_v7, %v307_v9  ;;  %v335_v52 = vsel %vm289_vm15, %v333_v41, %v334_v42  ;;  %v332_v55 = vsel %vm283_vm0, %v330_v50, %v331_v51 }
 0x136   :  { %409 = vst [vmem:[#allocation1 + $0x2] ss:$9 sm:$0xff] %v376_v12  ;;  %v301_v12 = vsel %vm283_vm0, %v299_v63, %v300_v2  ;;  %v327_v36 = vsel %vm287_vm12, %v269_v24, %v270_v25  ;;  %v324_v46 = vsel %vm281_vm14, %v269_v24, %v270_v25  ;;  %v336_v61 = vrot.slane %v335_v52, 1 }
 0x137   :  { %410 = vst [vmem:[#allocation1 + $0x3] ss:$9 sm:$0xff] %v377_v13  ;;  %v305_v13 = vrot.slane %v304_v3, 1  ;;  %v328_v47 = vsel %vm289_vm15, %v326_v35, %v327_v36  ;;  %v341_v63 = vsel %vm287_vm12, %v1828_v11, %v275_v22  ;;  %v276_v2 = vrot.slane %v1828_v11, 1 }
 0x138   :  { %411 = vst [vmem:[#allocation1 + $0x4] ss:$9 sm:$0xff] %v378_v15  ;;  %v312_v15 = vrot.slane %v311_v10, 1  ;;  %v277_v3 = vrot.slane %v1828_v11, 2 }
 0x139   :  { %412 = vst [vmem:[#allocation1 + $0x5] ss:$9 sm:$0xff] %v379_v16  ;;  %v265_v16 = vrot.slane %v1813_v0, 1  ;;  %v344_v7 = vsel %vm279_vm13, %v1828_v11, %v276_v2 }
 0x13a   :  { %413 = vst [vmem:[#allocation1 + $0x6] ss:$9 sm:$0xff] %v382_v17  ;;  %v266_v17 = vrot.slane %v1813_v0, 2 }
 0x13b   :  { %414 = vst [vmem:[#allocation1 + $0x7] ss:$9 sm:$0xff] %v383_v18  ;;  %v267_v18 = vrot.slane %v1813_v0, 3  ;;  %v319_v29 = vsel %vm285_vm11, %v1813_v0, %v265_v16  ;;  %v316_v37 = vsel %vm279_vm13, %v1813_v0, %v265_v16 }
 0x13d   :  { %v320_v30 = vsel %vm287_vm12, %v266_v17, %v267_v18  ;;  %v317_v38 = vsel %vm281_vm14, %v266_v17, %v267_v18 }
 0x13e   :  { %v321_v39 = vsel %vm289_vm15, %v319_v29, %v320_v30  ;;  %v318_v48 = vsel %vm283_vm0, %v316_v37, %v317_v38 }
 0x13f   :  { %v322_v49 = vrot.slane %v321_v39, 1 }
 0x142   :  { %v415_v31 = vld [vmem:[#allocation1] sm:$0xff] }
 0x143   :  { %416 = vst [vmem:[#allocation1] ss:$9 sm:$0xff] %v384_v19  ;;  %1572 = vmatmul.msk.f32.gmra.mxu2 %vm419_vm10, %v415_v31  ;;  %v263_v19 = vrot.slane %v1809_v60, 1 }
 0x144   :  { %417 = vst [vmem:[#allocation1 + $0x1] ss:$9 sm:$0xff] %v385_v20  ;;  %v264_v20 = vrot.slane %v1809_v60, 3 }
 0x145   :  { %v313_v31 = vsel %vm279_vm13, %v1809_v60, %v263_v19 }
 0x146   :  { %v314_v32 = vsel %vm281_vm14, %v1813_v0, %v264_v20 }
 0x147   :  { %v315_v40 = vsel %vm283_vm0, %v313_v31, %v314_v32 }
 0x14b   :  { %v418_v62 = vld [vmem:[#allocation1] sm:$0xff] }
 0x14c   :  { %452 = vst [vmem:[#allocation1] ss:$9 sm:$0xff] %v284_v53  ;;  %1573 = vmatmul.msk.f32.gmra.mxu2 %vm419_vm10, %v418_v62  ;;  %v325_v53 = vsel %vm283_vm0, %v323_v45, %v324_v46  ;;  %v340_v62 = vsel %vm285_vm11, %v1823_v8, %v274_v21 }
 0x14d   :  { %454 = vst [vmem:[#allocation1 + $0x1] ss:$9 sm:$0xff] %v291_v54  ;;  %v329_v54 = vrot.slane %v328_v47, 1  ;;  %v1973_v47 = vpop.f32.mrf.mxu1 }
 0x14e   :  { %456 = vst [vmem:[#allocation1 + $0x2] ss:$9 sm:$0xff] %v294_v5  ;;  %v278_v5 = vrot.slane %v1828_v11, 3 }
 0x14f   :  { %458 = vst [vmem:[#allocation1 + $0x3] ss:$9 sm:$0xff] %v298_v6  ;;  %v342_v6 = vsel %vm289_vm15, %v340_v62, %v341_v63 }
 0x150   :  { %460 = vst [vmem:[#allocation1 + $0x4] ss:$9 sm:$0xff] %v301_v12  ;;  %v345_v9 = vsel %vm281_vm14, %v277_v3, %v278_v5  ;;  %v343_v10 = vrot.slane %v342_v6, 1 }
 0x151   :  { %462 = vst [vmem:[#allocation1 + $0x5] ss:$9 sm:$0xff] %v305_v13  ;;  %v346_v13 = vsel %vm283_vm0, %v344_v7, %v345_v9 }
 0x152   :  { %464 = vst [vmem:[#allocation1 + $0x6] ss:$9 sm:$0xff] %v308_v14 }
 0x153   :  { %466 = vst [vmem:[#allocation1 + $0x7] ss:$9 sm:$0xff] %v312_v15  ;;  %v1968_v15 = vld [vmem:[%s2376_s5] ss:$0 sm:$0xff]  ;;  %s1693_s5 = smov 120  }
 0x154   :  { %815 = vrot.lane.b32.xlu2 %v1968_v15, %s1693_s5  ;;  %1357 = vrot.lane.b32.xlu0 %v1968_v15, %s1695_s21 }
 0x155   :  { %v1980_v51 = vpop.f32.mrf.mxu1 }
 0x15a   :  { %v467_v44 = vld [vmem:[#allocation1] sm:$0xff] }
 0x15b   :  { %475 = vst [vmem:[#allocation1 + $0x7] ss:$9 sm:$0xff] %v339_v43  ;;  %1574 = vmatmul.msk.f32.vlgmr.msra.gmra.mxu3 %vm419_vm10, %v467_v44 }
 0x15c   :  { %468 = vst [vmem:[#allocation1] ss:$9 sm:$0xff] %v315_v40 }
 0x15d   :  { %469 = vst [vmem:[#allocation1 + $0x1] ss:$9 sm:$0xff] %v318_v48  ;;  %v1987_v63 = vpop.f32.mrf.mxu1 }
 0x15e   :  { %470 = vst [vmem:[#allocation1 + $0x2] ss:$9 sm:$0xff] %v322_v49  ;;  %v1977_v49 = vrot.slane %v1973_v47, 4  ;;  %v1990_v6 = vrot.slane %v1987_v63, 4 }
 0x15f   :  { %471 = vst [vmem:[#allocation1 + $0x3] ss:$9 sm:$0xff] %v325_v53  ;;  %v1983_v53 = vrot.slane %v1980_v51, 4 }
 0x160   :  { %472 = vst [vmem:[#allocation1 + $0x4] ss:$9 sm:$0xff] %v329_v54 }
 0x161   :  { %473 = vst [vmem:[#allocation1 + $0x5] ss:$9 sm:$0xff] %v332_v55 }
 0x162   :  { %474 = vst [vmem:[#allocation1 + $0x6] ss:$9 sm:$0xff] %v336_v61 }
 0x169   :  { %v476_v12 = vld [vmem:[#allocation1] sm:$0xff] }
 0x16a   :  { %1575 = vmatmul.msk.f32.gmra.mxu3 %vm419_vm10, %v476_v12  ;;  %477 = vst [vmem:[#allocation1] ss:$9 sm:$0xff] %v343_v10 }
 0x16b   :  { %478 = vst [vmem:[#allocation1 + $0x1] ss:$9 sm:$0xff] %v346_v13 }
 0x172   :  { %v479_v14 = vld [vmem:[#allocation1] sm:$0xff] }
 0x173   :  { %1576 = vmatmul.msk.f32.gmra.mxu3 %vm419_vm10, %v479_v14 }
 0x1b7   :  { %v443_v16 = vpop.f32.mrf.mxu2 }
 0x1c6   :  { %v446_v28 = vpop.f32.mrf.mxu2 }
 0x1cf   :  { %v449_v35 = vpop.f32.mrf.mxu2 }
 0x1de   :  { %v503_v17 = vpop.f32.mrf.mxu3 }
 0x1df   :  { %v504_v18 = vadd.f32 %v503_v17, %v443_v16  ;;  %v1584_v17 = vld [vmem:[%s2374_s3 + $0x78] sm:$0xff] }
 0x1e0   :  { %737 = vmatpush.msrb.mxu2 %v1584_v17 }
 0x1e1   :  { %v515_v19 = vadd.f32 %v1968_v15, %v504_v18 }
 0x1e3   :  { %v518_v20 = vmax.f32 %v515_v19, 0.0 }
 0x1e5   :  { %v524_v21 = vrot.slane %v518_v20, 1  ;;  %v525_v22 = vrot.slane %v518_v20, 2  ;;  %v526_v23 = vrot.slane %v518_v20, 3  ;;  %539 = vst [vmem:[#allocation1] ss:$9 sm:$0xff] %v518_v20  ;;  %v527_v24 = vrot.slane %v518_v20, 4 }
 0x1e6   :  { %v528_v25 = vrot.slane %v518_v20, 5  ;;  %v529_v26 = vrot.slane %v518_v20, 6  ;;  %v530_v27 = vrot.slane %v518_v20, 7  ;;  %v1583_v20 = vld [vmem:[%s2374_s3 + $0x70] sm:$0xff] }
 0x1e7   :  { %541 = vst [vmem:[#allocation1 + $0x1] ss:$9 sm:$0xff] %v524_v21  ;;  %738 = vmatpush.msrb.mxu2 %v1583_v20 }
 0x1e8   :  { %543 = vst [vmem:[#allocation1 + $0x2] ss:$9 sm:$0xff] %v525_v22 }
 0x1e9   :  { %545 = vst [vmem:[#allocation1 + $0x3] ss:$9 sm:$0xff] %v526_v23 }
 0x1ea   :  { %547 = vst [vmem:[#allocation1 + $0x4] ss:$9 sm:$0xff] %v527_v24 }
 0x1eb   :  { %549 = vst [vmem:[#allocation1 + $0x5] ss:$9 sm:$0xff] %v528_v25 }
 0x1ec   :  { %551 = vst [vmem:[#allocation1 + $0x6] ss:$9 sm:$0xff] %v529_v26 }
 0x1ed   :  { %553 = vst [vmem:[#allocation1 + $0x7] ss:$9 sm:$0xff] %v530_v27  ;;  %v506_v29 = vpop.f32.mrf.mxu3 }
 0x1ee   :  { %v507_v30 = vadd.f32 %v506_v29, %v446_v28 }
 0x1f0   :  { %v516_v31 = vadd.f32 %v1968_v15, %v507_v30  ;;  %v1582_v30 = vld [vmem:[%s2374_s3 + $0x68] sm:$0xff] }
 0x1f1   :  { %739 = vmatpush.msrb.mxu2 %v1582_v30 }
 0x1f2   :  { %v519_v32 = vmax.f32 %v516_v31, 0.0  ;;  %v1581_v31 = vld [vmem:[%s2374_s3 + $0x60] sm:$0xff] }
 0x1f3   :  { %740 = vmatpush.msrb.mxu2 %v1581_v31 }
 0x1f4   :  { %v554_v33 = vld [vmem:[#allocation1] sm:$0xff]  ;;  %v532_v37 = vrot.slane %v519_v32, 2  ;;  %v533_v38 = vrot.slane %v519_v32, 3  ;;  %v534_v40 = vrot.slane %v519_v32, 4  ;;  %v535_v41 = vrot.slane %v519_v32, 5 }
 0x1f5   :  { %555 = vst [vmem:[#allocation1] ss:$9 sm:$0xff] %v519_v32  ;;  %v536_v43 = vrot.slane %v519_v32, 6  ;;  %v537_v44 = vrot.slane %v519_v32, 7  ;;  %v531_v45 = vrot.slane %v519_v32, 1  ;;  %v573_v18 = vsel %vm572_vm1, %v554_v33, -inf }
 0x1f6   :  { %v509_v34 = vpop.f32.mrf.mxu3 }
 0x1f7   :  { %v510_v36 = vadd.f32 %v509_v34, %v449_v35 }
 0x1f9   :  { %v517_v42 = vadd.f32 %v1968_v15, %v510_v36  ;;  %v1580_v36 = vld [vmem:[%s2374_s3 + $0x58] sm:$0xff] }
 0x1fa   :  { %801 = vmatpush.msrb.mxu3 %v1580_v36 }
 0x1fb   :  { %v520_v46 = vmax.f32 %v517_v42, 0.0  ;;  %v599_v42 = vrot.slane %v1977_v49, 3 }
 0x1fc   :  { %v556_v39 = vld [vmem:[#allocation1] sm:$0xff] }
 0x1fd   :  { %558 = vst [vmem:[#allocation1 + $0x1] ss:$9 sm:$0xff] %v532_v37  ;;  %v538_v48 = vrot.slane %v520_v46, 1  ;;  %v575_v19 = vsel %vm574_vm2, %v556_v39, -inf  ;;  %v1579_v37 = vld [vmem:[%s2374_s3 + $0x50] sm:$0xff]  ;;  %v1577_v39 = vld [vmem:[%s2374_s3 + $0x40] sm:$0xff] }
 0x1fe   :  { %559 = vst [vmem:[#allocation1 + $0x2] ss:$9 sm:$0xff] %v533_v38  ;;  %v2003_v21 = vmax.f32 %v573_v18, %v575_v19  ;;  %v1578_v38 = vld [vmem:[%s2374_s3 + $0x48] sm:$0xff]  ;;  %802 = vmatpush.msrb.mxu3 %v1579_v37  ;;  %s1694_s3 = smov 112  }
 0x1ff   :  { %560 = vst [vmem:[#allocation1 + $0x3] ss:$9 sm:$0xff] %v534_v40  ;;  %1083 = vrot.lane.b32.xlu1 %v1968_v15, %s1694_s3  ;;  %v928_v15 = vrot.slane %v1816_v1, 7 }
 0x200   :  { %561 = vst [vmem:[#allocation1 + $0x4] ss:$9 sm:$0xff] %v535_v41  ;;  %803 = vmatpush.msrb.mxu3 %v1578_v38  ;;  %v598_v41 = vrot.slane %v1973_v47, 3 }
 0x201   :  { %562 = vst [vmem:[#allocation1 + $0x5] ss:$9 sm:$0xff] %v536_v43 }
 0x202   :  { %563 = vst [vmem:[#allocation1 + $0x6] ss:$9 sm:$0xff] %v537_v44  ;;  %804 = vmatpush.msrb.mxu3 %v1577_v39  ;;  %v605_v43 = vsel %vm285_vm11, %v1973_v47, %v598_v41  ;;  %v607_v44 = vsel %vm281_vm14, %v1973_v47, %v598_v41 }
 0x203   :  { %557 = vst [vmem:[#allocation1] ss:$9 sm:$0xff] %v531_v45  ;;  %v609_v45 = vsel %vm287_vm12, %v1973_v47, %v598_v41 }
 0x204   :  { %564 = vst [vmem:[#allocation1 + $0x7] ss:$9 sm:$0xff] %v520_v46  ;;  %v604_v46 = vsel %vm279_vm13, %v1973_v47, %v598_v41 }
 0x20b   :  { %v565_v50 = vld [vmem:[#allocation1] sm:$0xff] }
 0x20c   :  { %566 = vst [vmem:[#allocation1] ss:$9 sm:$0xff] %v538_v48  ;;  %v583_v32 = vsel %vm572_vm1, %v565_v50, -inf  ;;  %v606_v48 = vrot.slane %v605_v43, 1 }
 0x20d   :  { %648 = vst [vmem:[#allocation1 + $0x20] sm:$0xff] %v1977_v49 }
 0x213   :  { %v567_v52 = vld [vmem:[#allocation1] sm:$0xff] }
 0x214   :  { %647 = vst [vmem:[#allocation1] sm:$0xff] %v1973_v47  ;;  %v656_v54 = vld [vmem:[#allocation1 + $0x20] ss:$4 sm:$0xff]  ;;  %v658_v55 = vld [vmem:[#allocation1 + $0x21] ss:$4 sm:$0xff]  ;;  %v584_v33 = vsel %vm574_vm2, %v567_v52, -inf }
 0x215   :  { %v660_v61 = vld [vmem:[#allocation1 + $0x22] ss:$4 sm:$0xff]  ;;  %v662_v62 = vld [vmem:[#allocation1 + $0x23] ss:$4 sm:$0xff]  ;;  %v2013_v34 = vmax.f32 %v583_v32, %v584_v33  ;;  %v608_v52 = vrot.slane %v607_v44, 2 }
 0x216   :  { %668 = vst [vmem:[#allocation1 + $0x20] sm:$0xff] %v1983_v53 }
 0x21b   :  { %v650_v2 = vld [vmem:[#allocation1 + $0x1] ss:$4 sm:$0xff]  ;;  %v652_v3 = vld [vmem:[#allocation1 + $0x2] ss:$4 sm:$0xff]  ;;  %v654_v5 = vld [vmem:[#allocation1 + $0x3] ss:$4 sm:$0xff] }
 0x21c   :  { %663 = vst [vmem:[#allocation1] sm:$0xff] %v1980_v51 }
 0x21d   :  { %v669_v7 = vld [vmem:[#allocation1 + $0x21] ss:$4 sm:$0xff]  ;;  %v670_v9 = vld [vmem:[#allocation1 + $0x22] ss:$4 sm:$0xff]  ;;  %v671_v10 = vld [vmem:[#allocation1 + $0x23] ss:$4 sm:$0xff] }
 0x21e   :  { %673 = vst [vmem:[#allocation1 + $0x20] sm:$0xff] %v1990_v6 }
 0x223   :  { %v664_v12 = vld [vmem:[#allocation1] ss:$4 sm:$0xff]  ;;  %v665_v13 = vld [vmem:[#allocation1 + $0x1] ss:$4 sm:$0xff]  ;;  %v666_v14 = vld [vmem:[#allocation1 + $0x2] ss:$4 sm:$0xff] }
 0x224   :  { %v667_v16 = vld [vmem:[#allocation1 + $0x3] ss:$4 sm:$0xff] }
 0x225   :  { %672 = vst [vmem:[#allocation1] sm:$0xff] %v1987_v63  ;;  %v678_v22 = vld [vmem:[#allocation1 + $0x20] ss:$4 sm:$0xff]  ;;  %v679_v23 = vld [vmem:[#allocation1 + $0x21] ss:$4 sm:$0xff] }
 0x226   :  { %v680_v24 = vld [vmem:[#allocation1 + $0x22] ss:$4 sm:$0xff]  ;;  %v681_v29 = vld [vmem:[#allocation1 + $0x23] ss:$4 sm:$0xff] }
 0x22c   :  { %v674_v25 = vld [vmem:[#allocation1] ss:$4 sm:$0xff]  ;;  %v675_v26 = vld [vmem:[#allocation1 + $0x1] ss:$4 sm:$0xff]  ;;  %v676_v27 = vld [vmem:[#allocation1 + $0x2] ss:$4 sm:$0xff] }
 0x22d   :  { %v677_v28 = vld [vmem:[#allocation1 + $0x3] ss:$4 sm:$0xff] }
 0x22e   :  { %687 = vst [vmem:[#allocation1] ss:$9 sm:$0xff] %v650_v2  ;;  %v611_v2 = vsel %vm279_vm13, %v1977_v49, %v599_v42 }
 0x22f   :  { %689 = vst [vmem:[#allocation1 + $0x1] ss:$9 sm:$0xff] %v652_v3 }
 0x230   :  { %691 = vst [vmem:[#allocation1 + $0x2] ss:$9 sm:$0xff] %v654_v5 }
 0x231   :  { %693 = vst [vmem:[#allocation1 + $0x3] ss:$9 sm:$0xff] %v656_v54  ;;  %v612_v54 = vsel %vm285_vm11, %v1977_v49, %v599_v42 }
 0x232   :  { %695 = vst [vmem:[#allocation1 + $0x4] ss:$9 sm:$0xff] %v658_v55  ;;  %v610_v55 = vrot.slane %v609_v45, 3  ;;  %v613_v3 = vrot.slane %v612_v54, 1  ;;  %v1595_v54 = vld [vmem:[%s2375_s4 + $0x30] sm:$0xff] }
 0x233   :  { %697 = vst [vmem:[#allocation1 + $0x5] ss:$9 sm:$0xff] %v660_v61  ;;  %v614_v61 = vsel %vm281_vm14, %v1977_v49, %v599_v42 }
 0x234   :  { %699 = vst [vmem:[#allocation1 + $0x6] ss:$9 sm:$0xff] %v662_v62  ;;  %v616_v62 = vsel %vm287_vm12, %v1977_v49, %v599_v42  ;;  %v615_v5 = vrot.slane %v614_v61, 2  ;;  %v1594_v61 = vld [vmem:[%s2375_s4 + $0x28] sm:$0xff] }
 0x235   :  { %701 = vst [vmem:[#allocation1 + $0x7] ss:$9 sm:$0xff] %v664_v12 }
 0x23c   :  { %v702_v35 = vld [vmem:[#allocation1] sm:$0xff] }
 0x23d   :  { %703 = vst [vmem:[#allocation1] ss:$9 sm:$0xff] %v665_v13  ;;  %1585 = vmatmul.msk.f32.vlgmr.msrb.gmra.mxu2 %vm419_vm10, %v702_v35 }
 0x23e   :  { %704 = vst [vmem:[#allocation1 + $0x1] ss:$9 sm:$0xff] %v666_v14 }
 0x23f   :  { %705 = vst [vmem:[#allocation1 + $0x2] ss:$9 sm:$0xff] %v667_v16 }
 0x240   :  { %706 = vst [vmem:[#allocation1 + $0x3] ss:$9 sm:$0xff] %v669_v7  ;;  %v617_v7 = vrot.slane %v616_v62, 3 }
 0x241   :  { %707 = vst [vmem:[#allocation1 + $0x4] ss:$9 sm:$0xff] %v670_v9  ;;  %v600_v9 = vrot.slane %v1980_v51, 3 }
 0x242   :  { %708 = vst [vmem:[#allocation1 + $0x5] ss:$9 sm:$0xff] %v671_v10  ;;  %v601_v10 = vrot.slane %v1983_v53, 3 }
 0x243   :  { %709 = vst [vmem:[#allocation1 + $0x6] ss:$9 sm:$0xff] %v674_v25  ;;  %v619_v12 = vsel %vm285_vm11, %v1980_v51, %v600_v9  ;;  %v621_v13 = vsel %vm281_vm14, %v1980_v51, %v600_v9  ;;  %v618_v14 = vsel %vm279_vm13, %v1980_v51, %v600_v9  ;;  %v602_v25 = vrot.slane %v1987_v63, 3 }
 0x244   :  { %710 = vst [vmem:[#allocation1 + $0x7] ss:$9 sm:$0xff] %v675_v26  ;;  %v620_v16 = vrot.slane %v619_v12, 1  ;;  %v624_v17 = vsel %vm285_vm11, %v1983_v53, %v601_v10  ;;  %v622_v19 = vrot.slane %v621_v13, 2  ;;  %v626_v20 = vsel %vm281_vm14, %v1983_v53, %v601_v10 }
 0x245   :  { %v627_v26 = vrot.slane %v626_v20, 2  ;;  %v631_v30 = vsel %vm285_vm11, %v1987_v63, %v602_v25  ;;  %v633_v31 = vsel %vm281_vm14, %v1987_v63, %v602_v25  ;;  %v635_v32 = vsel %vm287_vm12, %v1987_v63, %v602_v25 }
 0x246   :  { %v632_v33 = vrot.slane %v631_v30, 1  ;;  %v634_v35 = vrot.slane %v633_v31, 2  ;;  %v636_v38 = vrot.slane %v635_v32, 3 }
 0x24b   :  { %v711_v40 = vld [vmem:[#allocation1] sm:$0xff] }
 0x24c   :  { %712 = vst [vmem:[#allocation1] ss:$9 sm:$0xff] %v676_v27  ;;  %1586 = vmatmul.msk.f32.gmra.mxu2 %vm419_vm10, %v711_v40 }
 0x24d   :  { %713 = vst [vmem:[#allocation1 + $0x1] ss:$9 sm:$0xff] %v677_v28  ;;  %v630_v28 = vsel %vm279_vm13, %v1987_v63, %v602_v25 }
 0x24e   :  { %714 = vst [vmem:[#allocation1 + $0x2] ss:$9 sm:$0xff] %v678_v22  ;;  %v628_v22 = vsel %vm287_vm12, %v1983_v53, %v601_v10  ;;  %vm1437_vm12 = vcmask 130048  }
 0x24f   :  { %715 = vst [vmem:[#allocation1 + $0x3] ss:$9 sm:$0xff] %v679_v23  ;;  %v623_v23 = vsel %vm279_vm13, %v1983_v53, %v601_v10  ;;  %v629_v27 = vrot.slane %v628_v22, 3 }
 0x250   :  { %716 = vst [vmem:[#allocation1 + $0x4] ss:$9 sm:$0xff] %v680_v24  ;;  %v625_v24 = vrot.slane %v624_v17, 1 }
 0x251   :  { %717 = vst [vmem:[#allocation1 + $0x5] ss:$9 sm:$0xff] %v681_v29  ;;  %v603_v29 = vrot.slane %v1990_v6, 3 }
 0x253   :  { %v638_v36 = vsel %vm285_vm11, %v1990_v6, %v603_v29  ;;  %v640_v39 = vsel %vm281_vm14, %v1990_v6, %v603_v29  ;;  %v637_v40 = vsel %vm279_vm13, %v1990_v6, %v603_v29 }
 0x254   :  { %v639_v41 = vrot.slane %v638_v36, 1  ;;  %v641_v42 = vrot.slane %v640_v39, 2  ;;  %v905_v39 = vld [vmem:[%s2375_s4 + $0x8] sm:$0xff] }
 0x258   :  { %v718_v50 = vld [vmem:[#allocation1] sm:$0xff] }
 0x259   :  { %751 = vst [vmem:[#allocation1] ss:$9 sm:$0xff] %v604_v46  ;;  %1587 = vmatmul.msk.f32.gmra.mxu2 %vm419_vm10, %v718_v50  ;;  %v816_v46 = vpop.permute.xlu2 %815 }
 0x25a   :  { %753 = vst [vmem:[#allocation1 + $0x1] ss:$9 sm:$0xff] %v606_v48 }
 0x25b   :  { %755 = vst [vmem:[#allocation1 + $0x2] ss:$9 sm:$0xff] %v608_v52  ;;  %v1596_v52 = vld [vmem:[%s2375_s4 + $0x38] sm:$0xff] }
 0x25c   :  { %757 = vst [vmem:[#allocation1 + $0x3] ss:$9 sm:$0xff] %v610_v55  ;;  %1634 = vmatpush.msra.mxu3 %v1596_v52  ;;  %977 = vmatpush.msrb.mxu0 %v1596_v52 }
 0x25d   :  { %759 = vst [vmem:[#allocation1 + $0x4] ss:$9 sm:$0xff] %v611_v2 }
 0x25e   :  { %761 = vst [vmem:[#allocation1 + $0x5] ss:$9 sm:$0xff] %v613_v3  ;;  %1635 = vmatpush.msra.mxu3 %v1595_v54  ;;  %978 = vmatpush.msrb.mxu0 %v1595_v54 }
 0x25f   :  { %763 = vst [vmem:[#allocation1 + $0x6] ss:$9 sm:$0xff] %v615_v5 }
 0x260   :  { %765 = vst [vmem:[#allocation1 + $0x7] ss:$9 sm:$0xff] %v617_v7  ;;  %v1593_v7 = vld [vmem:[%s2375_s4 + $0x20] sm:$0xff]  ;;  %1636 = vmatpush.msra.mxu3 %v1594_v61  ;;  %979 = vmatpush.msrb.mxu0 %v1594_v61 }
 0x262   :  { %1637 = vmatpush.msra.mxu3 %v1593_v7  ;;  %980 = vmatpush.msrb.mxu0 %v1593_v7  ;;  %v918_v7 = vrot.slane %v1800_v58, 7 }
 0x267   :  { %v766_v18 = vld [vmem:[#allocation1] sm:$0xff] }
 0x268   :  { %1588 = vmatmul.msk.f32.vlgmr.msrb.gmra.mxu3 %vm419_vm10, %v766_v18  ;;  %767 = vst [vmem:[#allocation1] ss:$9 sm:$0xff] %v618_v14 }
 0x269   :  { %768 = vst [vmem:[#allocation1 + $0x1] ss:$9 sm:$0xff] %v620_v16 }
 0x26a   :  { %769 = vst [vmem:[#allocation1 + $0x2] ss:$9 sm:$0xff] %v622_v19 }
 0x26b   :  { %770 = vst [vmem:[#allocation1 + $0x3] ss:$9 sm:$0xff] %v623_v23 }
 0x26c   :  { %771 = vst [vmem:[#allocation1 + $0x4] ss:$9 sm:$0xff] %v625_v24 }
 0x26d   :  { %772 = vst [vmem:[#allocation1 + $0x5] ss:$9 sm:$0xff] %v627_v26 }
 0x26e   :  { %773 = vst [vmem:[#allocation1 + $0x6] ss:$9 sm:$0xff] %v629_v27 }
 0x26f   :  { %774 = vst [vmem:[#allocation1 + $0x7] ss:$9 sm:$0xff] %v630_v28 }
 0x276   :  { %v775_v37 = vld [vmem:[#allocation1] sm:$0xff] }
 0x277   :  { %1589 = vmatmul.msk.f32.gmra.mxu3 %vm419_vm10, %v775_v37  ;;  %776 = vst [vmem:[#allocation1] ss:$9 sm:$0xff] %v632_v33  ;;  %v907_v37 = vld [vmem:[%s2375_s4 + $0x18] sm:$0xff] }
 0x278   :  { %777 = vst [vmem:[#allocation1 + $0x1] ss:$9 sm:$0xff] %v634_v35  ;;  %1021 = vmatpush.msrb.mxu1 %v907_v37 }
 0x279   :  { %778 = vst [vmem:[#allocation1 + $0x2] ss:$9 sm:$0xff] %v636_v38  ;;  %v906_v38 = vld [vmem:[%s2375_s4 + $0x10] sm:$0xff] }
 0x27a   :  { %779 = vst [vmem:[#allocation1 + $0x3] ss:$9 sm:$0xff] %v637_v40  ;;  %1022 = vmatpush.msrb.mxu1 %v906_v38 }
 0x27b   :  { %780 = vst [vmem:[#allocation1 + $0x4] ss:$9 sm:$0xff] %v639_v41  ;;  %v904_v41 = vld [vmem:[%s2375_s4] sm:$0xff] }
 0x27c   :  { %781 = vst [vmem:[#allocation1 + $0x5] ss:$9 sm:$0xff] %v641_v42  ;;  %1023 = vmatpush.msrb.mxu1 %v905_v39 }
 0x27e   :  { %1024 = vmatpush.msrb.mxu1 %v904_v41 }
 0x283   :  { %v782_v43 = vld [vmem:[#allocation1] sm:$0xff] }
 0x284   :  { %1590 = vmatmul.msk.f32.gmra.mxu3 %vm419_vm10, %v782_v43  ;;  %v934_v43 = vrot.slane %v1823_v8, 7 }
 0x2c0   :  { %v742_v44 = vpop.f32.mrf.mxu2 }
 0x2cf   :  { %v745_v13 = vpop.f32.mrf.mxu2 }
 0x2dc   :  { %v748_v23 = vpop.f32.mrf.mxu2 }
 0x2eb   :  { %v806_v45 = vpop.f32.mrf.mxu3 }
 0x2ec   :  { %v807_v48 = vadd.f32 %v806_v45, %v742_v44  ;;  %v1592_v45 = vrot.slane %v1813_v0, 9 }
 0x2ee   :  { %v818_v50 = vadd.f32 %v816_v46, %v807_v48 }
 0x2f0   :  { %v821_v55 = vmax.f32 %v818_v50, 0.0  ;;  %v930_v50 = vrot.slane %v928_v15, 2 }
 0x2f2   :  { %v827_v62 = vrot.slane %v821_v55, 1  ;;  %v828_v2 = vrot.slane %v821_v55, 2  ;;  %v829_v3 = vrot.slane %v821_v55, 3  ;;  %846 = vst [vmem:[#allocation1] ss:$9 sm:$0xff] %v821_v55  ;;  %v830_v5 = vrot.slane %v821_v55, 4 }
 0x2f3   :  { %v831_v9 = vrot.slane %v821_v55, 5  ;;  %v832_v10 = vrot.slane %v821_v55, 6  ;;  %v833_v12 = vrot.slane %v821_v55, 7 }
 0x2f4   :  { %848 = vst [vmem:[#allocation1 + $0x1] ss:$9 sm:$0xff] %v827_v62  ;;  %v936_v62 = vrot.slane %v934_v43, 2 }
 0x2f5   :  { %850 = vst [vmem:[#allocation1 + $0x2] ss:$9 sm:$0xff] %v828_v2  ;;  %v937_v2 = vrot.slane %v1828_v11, 7 }
 0x2f6   :  { %852 = vst [vmem:[#allocation1 + $0x3] ss:$9 sm:$0xff] %v829_v3 }
 0x2f7   :  { %854 = vst [vmem:[#allocation1 + $0x4] ss:$9 sm:$0xff] %v830_v5  ;;  %v915_v5 = vrot.slane %v1797_v57, 7 }
 0x2f8   :  { %856 = vst [vmem:[#allocation1 + $0x5] ss:$9 sm:$0xff] %v831_v9  ;;  %v929_v9 = vsel %vm2118_vm8, %v1592_v45, %v928_v15  ;;  %v1617_v45 = vld [vmem:[%s2375_s4 + $0x90] sm:$0xff] }
 0x2f9   :  { %858 = vst [vmem:[#allocation1 + $0x6] ss:$9 sm:$0xff] %v832_v10 }
 0x2fa   :  { %860 = vst [vmem:[#allocation1 + $0x7] ss:$9 sm:$0xff] %v833_v12  ;;  %v809_v14 = vpop.f32.mrf.mxu3 }
 0x2fb   :  { %v810_v16 = vadd.f32 %v809_v14, %v745_v13  ;;  %v1604_v13 = vld [vmem:[%s2375_s4 + $0x58] sm:$0xff]  ;;  %v1603_v14 = vld [vmem:[%s2375_s4 + $0x50] sm:$0xff] }
 0x2fc   :  { %1070 = vmatpush.msra.mxu2 %v1604_v13  ;;  %v1108_v13 = vrot.slane %v1987_v63, 2 }
 0x2fd   :  { %v819_v17 = vadd.f32 %v816_v46, %v810_v16  ;;  %v577_v16 = vrot.slane %v2003_v21, 4 }
 0x2fe   :  { %1071 = vmatpush.msra.mxu2 %v1603_v14 }
 0x2ff   :  { %v822_v18 = vmax.f32 %v819_v17, 0.0  ;;  %v586_v17 = vrot.slane %v2013_v34, 4 }
 0x301   :  { %v834_v19 = vrot.slane %v822_v18, 1  ;;  %v835_v20 = vrot.slane %v822_v18, 2  ;;  %v861_v22 = vld [vmem:[#allocation1] sm:$0xff]  ;;  %v836_v26 = vrot.slane %v822_v18, 3  ;;  %v837_v28 = vrot.slane %v822_v18, 4 }
 0x302   :  { %862 = vst [vmem:[#allocation1] ss:$9 sm:$0xff] %v822_v18  ;;  %v838_v30 = vrot.slane %v822_v18, 5  ;;  %v839_v32 = vrot.slane %v822_v18, 6  ;;  %v840_v33 = vrot.slane %v822_v18, 7  ;;  %v883_v42 = vsel %vm572_vm1, %v861_v22, -inf }
 0x303   :  { %863 = vst [vmem:[#allocation1 + $0x1] ss:$9 sm:$0xff] %v834_v19  ;;  %v938_v19 = vsel %vm2118_vm8, %v936_v62, %v937_v2  ;;  %v1107_v62 = vrot.slane %v1983_v53, 2 }
 0x304   :  { %864 = vst [vmem:[#allocation1 + $0x2] ss:$9 sm:$0xff] %v835_v20  ;;  %v1602_v20 = vld [vmem:[%s2375_s4 + $0x48] sm:$0xff] }
 0x305   :  { %1072 = vmatpush.msra.mxu2 %v1602_v20  ;;  %v2187_v14 = vsel %vm1111_vm9, %v1983_v53, %v1107_v62 }
 0x307   :  { %v812_v24 = vpop.f32.mrf.mxu3 }
 0x308   :  { %v813_v25 = vadd.f32 %v812_v24, %v748_v23  ;;  %v917_v23 = vrot.slane %v915_v5, 2  ;;  %v921_v24 = vrot.slane %v1803_v59, 7 }
 0x30a   :  { %v820_v27 = vadd.f32 %v816_v46, %v813_v25  ;;  %v931_v46 = vrot.slane %v1819_v4, 7  ;;  %v1591_v25 = vrot.slane %v1794_v56, 9 }
 0x30b   :  { %v865_v29 = vld [vmem:[#allocation1] sm:$0xff] }
 0x30c   :  { %v823_v31 = vmax.f32 %v820_v27, 0.0  ;;  %866 = vst [vmem:[#allocation1] ss:$9 sm:$0xff] %v836_v26  ;;  %v885_v40 = vsel %vm884_vm3, %v865_v29, -inf  ;;  %v933_v10 = vrot.slane %v931_v46, 2  ;;  %v932_v12 = vsel %vm2118_vm8, %v930_v50, %v931_v46  ;;  %v1601_v27 = vld [vmem:[%s2375_s4 + $0x40] sm:$0xff] }
 0x30d   :  { %867 = vst [vmem:[#allocation1 + $0x1] ss:$9 sm:$0xff] %v837_v28  ;;  %v886_v44 = vmax.f32 %v883_v42, %v885_v40  ;;  %v920_v26 = vrot.slane %v918_v7, 2  ;;  %v578_v28 = vmax.f32 %v2003_v21, %v577_v16  ;;  %v587_v29 = vmax.f32 %v2013_v34, %v586_v17  ;;  %1073 = vmatpush.msra.mxu2 %v1601_v27 }
 0x30e   :  { %v841_v35 = vrot.slane %v823_v31, 1  ;;  %868 = vst [vmem:[#allocation1 + $0x2] ss:$9 sm:$0xff] %v838_v30  ;;  %v842_v36 = vrot.slane %v823_v31, 2  ;;  %v843_v48 = vrot.slane %v823_v31, 3  ;;  %v844_v52 = vrot.slane %v823_v31, 4 }
 0x30f   :  { %869 = vst [vmem:[#allocation1 + $0x3] ss:$9 sm:$0xff] %v839_v32  ;;  %v845_v55 = vrot.slane %v823_v31, 5  ;;  %v887_v3 = vrot.slane %v886_v44, 4  ;;  %v935_v18 = vsel %vm2118_vm8, %v933_v10, %v934_v43  ;;  %v924_v30 = vrot.slane %v1809_v60, 7 }
 0x310   :  { %870 = vst [vmem:[#allocation1 + $0x4] ss:$9 sm:$0xff] %v840_v33  ;;  %v922_v34 = vsel %vm2118_vm8, %v920_v26, %v921_v24  ;;  %v579_v38 = vrot.slane %v578_v28, 2  ;;  %v588_v39 = vrot.slane %v587_v29, 2  ;;  %v2203_v27 = vsel %vm283_vm0, %v1987_v63, %v1108_v13 }
 0x311   :  { %871 = vst [vmem:[#allocation1 + $0x5] ss:$9 sm:$0xff] %v823_v31  ;;  %v888_v22 = vmax.f32 %v886_v44, %v887_v3  ;;  %v916_v31 = vsel %vm2118_vm8, %v1591_v25, %v915_v5  ;;  %v1618_v44 = vld [vmem:[%s2375_s4 + $0x98] sm:$0xff]  ;;  %v1120_v25 = vrot.slane %v2187_v14, 2 }
 0x312   :  { %872 = vst [vmem:[#allocation1 + $0x6] ss:$9 sm:$0xff] %v841_v35  ;;  %v919_v35 = vsel %vm2118_vm8, %v917_v23, %v918_v7  ;;  %1209 = vmatpush.msrb.mxu3 %v1618_v44  ;;  %v580_v46 = vmax.f32 %v578_v28, %v579_v38  ;;  %v1106_v7 = vrot.slane %v1980_v51, 2  ;;  %v2207_v28 = vsel %vm1111_vm9, %v1987_v63, %v1108_v13 }
 0x313   :  { %873 = vst [vmem:[#allocation1 + $0x7] ss:$9 sm:$0xff] %v842_v36  ;;  %v889_v33 = vrot.slane %v888_v22, 2  ;;  %v923_v36 = vrot.slane %v921_v24, 2 }
 0x314   :  { %1210 = vmatpush.msrb.mxu3 %v1617_v45  ;;  %v581_v2 = vrot.slane %v580_v46, 1 }
 0x315   :  { %v925_v15 = vsel %vm2118_vm8, %v923_v36, %v924_v30  ;;  %v890_v42 = vmax.f32 %v888_v22, %v889_v33  ;;  %v1105_v22 = vrot.slane %v1977_v49, 2  ;;  %v1130_v30 = vsel %vm1111_vm9, %v1980_v51, %v1106_v7 }
 0x316   :  { %v582_v16 = vmax.f32 %v580_v46, %v581_v2  ;;  %v1155_v33 = vrot.slane %v2203_v27, 7 }
 0x317   :  { %v2246_v38 = vsel %vm283_vm0, %v1977_v49, %v1105_v22 }
 0x31a   :  { %v874_v54 = vld [vmem:[#allocation1] sm:$0xff] }
 0x31b   :  { %875 = vst [vmem:[#allocation1] ss:$9 sm:$0xff] %v843_v48  ;;  %v893_v37 = vsel %vm572_vm1, %v874_v54, -inf  ;;  %v589_v48 = vmax.f32 %v587_v29, %v588_v39 }
 0x31c   :  { %876 = vst [vmem:[#allocation1 + $0x1] ss:$9 sm:$0xff] %v844_v52  ;;  %v891_v52 = vrot.slane %v890_v42, 1 }
 0x31d   :  { %877 = vst [vmem:[#allocation1 + $0x2] ss:$9 sm:$0xff] %v845_v55  ;;  %v1615_v55 = vld [vmem:[%s2375_s4 + $0x80] sm:$0xff]  ;;  %v590_v3 = vrot.slane %v589_v48, 1 }
 0x31e   :  { %952 = vst [vmem:[#allocation1 + $0x20] ss:$4 sm:$0xff] %v929_v9  ;;  %v892_v10 = vmax.f32 %v890_v42, %v891_v52  ;;  %v1157_v42 = vrot.slane %v1155_v33, 2 }
 0x31f   :  { %954 = vst [vmem:[#allocation1 + $0x21] ss:$4 sm:$0xff] %v932_v12  ;;  %v591_v17 = vmax.f32 %v589_v48, %v590_v3  ;;  %v1139_v48 = vrot.slane %v2246_v38, 7 }
 0x320   :  { %956 = vst [vmem:[#allocation1 + $0x22] ss:$4 sm:$0xff] %v935_v18  ;;  %v902_v23 = vmax.f32 %v582_v16, %v892_v10 }
 0x321   :  { %958 = vst [vmem:[#allocation1 + $0x23] ss:$4 sm:$0xff] %v938_v19  ;;  %v1104_v19 = vrot.slane %v1973_v47, 2 }
 0x323   :  { %v2215_v29 = vsel %vm1111_vm9, %v1973_v47, %v1104_v19  ;;  %v1110_v44 = vsel %vm283_vm0, %v1973_v47, %v1104_v19 }
 0x324   :  { %v878_v32 = vld [vmem:[#allocation1] sm:$0xff]  ;;  %v1113_v36 = vrot.slane %v2215_v29, 2  ;;  %v1611_v52 = vrot.slane %v1110_v44, 9  ;;  %v1626_v29 = vld [vmem:[%s2375_s4 + $0xa8] sm:$0xff] }
 0x325   :  { %944 = vst [vmem:[#allocation1] ss:$4 sm:$0xff] %v916_v31  ;;  %v894_v21 = vsel %vm884_vm3, %v878_v32, -inf  ;;  %v1118_v31 = vsel %vm283_vm0, %v1983_v53, %v1107_v62  ;;  %v1152_v32 = vrot.slane %v1120_v25, 7  ;;  %v1141_v62 = vrot.slane %v1139_v48, 2 }
 0x326   :  { %946 = vst [vmem:[#allocation1 + $0x1] ss:$4 sm:$0xff] %v919_v35  ;;  %v895_v40 = vmax.f32 %v893_v37, %v894_v21  ;;  %v1609_v35 = vld [vmem:[%s2375_s4 + $0x70] sm:$0xff]  ;;  %v1136_v45 = vrot.slane %v1113_v36, 7 }
 0x327   :  { %948 = vst [vmem:[#allocation1 + $0x2] ss:$4 sm:$0xff] %v922_v34  ;;  %v1608_v34 = vld [vmem:[%s2375_s4 + $0x68] sm:$0xff] }
 0x328   :  { %v960_v41 = vld.sshfl [vmem:[#allocation1 + $0x20] sm:$0xff pattern:$0x73625140]  ;;  %950 = vst [vmem:[#allocation1 + $0x3] ss:$4 sm:$0xff] %v925_v15  ;;  %v896_v43 = vrot.slane %v895_v40, 4  ;;  %v1137_v3 = vsel %vm2118_vm8, %v1611_v52, %v1136_v45 }
 0x329   :  { %1598 = vmatmul.msk.f32.vlgmr.msra.gmra.mxu3 %vm419_vm10, %v960_v41  ;;  %996 = vst [vmem:[#allocation1 + $0x20] ss:$4 sm:$0xff] %v1813_v0  ;;  %v1616_v0 = vld [vmem:[%s2375_s4 + $0x88] sm:$0xff]  ;;  %v1613_v15 = vrot.slane %v1118_v31, 9  ;;  %v1154_v41 = vrot.slane %v1152_v32, 2 }
 0x32a   :  { %998 = vst [vmem:[#allocation1 + $0x21] ss:$4 sm:$0xff] %v1816_v1  ;;  %v897_v50 = vmax.f32 %v895_v40, %v896_v43  ;;  %1211 = vmatpush.msrb.mxu3 %v1616_v0  ;;  %v1612_v40 = vrot.slane %v1130_v30, 9  ;;  %v1607_v43 = vld [vmem:[%s2375_s4 + $0x60] sm:$0xff] }
 0x32b   :  { %1000 = vst [vmem:[#allocation1 + $0x22] ss:$4 sm:$0xff] %v1819_v4  ;;  %v1156_v0 = vsel %vm2118_vm8, %v1154_v41, %v1155_v33  ;;  %v1358_v41 = vpop.permute.xlu0 %1357 }
 0x32c   :  { %1002 = vst [vmem:[#allocation1 + $0x23] ss:$4 sm:$0xff] %v1823_v8  ;;  %v898_v54 = vrot.slane %v897_v50, 2  ;;  %1212 = vmatpush.msrb.mxu3 %v1615_v55  ;;  %v1109_v55 = vrot.slane %v1990_v6, 2 }
 0x32e   :  { %v899_v5 = vmax.f32 %v897_v50, %v898_v54  ;;  %v1138_v54 = vrot.slane %v1136_v45, 2 }
 0x32f   :  { %v959_v9 = vld.sshfl [vmem:[#allocation1] sm:$0xff pattern:$0x73625140] }
 0x330   :  { %1597 = vmatmul.msk.f32.vlgmr.msrb.gmra.mxu0 %vm419_vm10, %v959_v9  ;;  %988 = vst [vmem:[#allocation1] ss:$4 sm:$0xff] %v1794_v56  ;;  %v900_v12 = vrot.slane %v899_v5, 1  ;;  %v2193_v56 = vsel %vm283_vm0, %v1980_v51, %v1106_v7  ;;  %v1140_v7 = vsel %vm2118_vm8, %v1138_v54, %v1139_v48  ;;  %v1124_v9 = vsel %vm283_vm0, %v1990_v6, %v1109_v55 }
 0x331   :  { %990 = vst [vmem:[#allocation1 + $0x1] ss:$4 sm:$0xff] %v1797_v57  ;;  %v1145_v26 = vrot.slane %v2193_v56, 7  ;;  %v1161_v13 = vrot.slane %v1124_v9, 7 }
 0x332   :  { %992 = vst [vmem:[#allocation1 + $0x2] ss:$4 sm:$0xff] %v1800_v58  ;;  %v901_v18 = vmax.f32 %v899_v5, %v900_v12 }
 0x333   :  { %994 = vst [vmem:[#allocation1 + $0x3] ss:$4 sm:$0xff] %v1803_v59  ;;  %v1004_v20 = vld.sshfl [vmem:[#allocation1 + $0x20] sm:$0xff pattern:$0x73625140]  ;;  %v1147_v37 = vrot.slane %v1145_v26, 2 }
 0x334   :  { %1045 = vst [vmem:[#allocation1 + $0x20] ss:$4 sm:$0xff] %v1816_v1  ;;  %v903_v24 = vmax.f32 %v591_v17, %v901_v18  ;;  %v1132_v17 = vsel %vm1111_vm9, %v1990_v6, %v1109_v55  ;;  %v1163_v19 = vrot.slane %v1161_v13, 2 }
 0x335   :  { %1047 = vst [vmem:[#allocation1 + $0x21] ss:$4 sm:$0xff] %v1819_v4  ;;  %v2220_v4 = vsel %vm1111_vm9, %v1977_v49, %v1105_v22 }
 0x336   :  { %1049 = vst [vmem:[#allocation1 + $0x22] ss:$4 sm:$0xff] %v1823_v8  ;;  %v2211_v1 = vsel %vm285_vm11, %v903_v24, %v902_v23  ;;  %v1123_v8 = vrot.slane %v2207_v28, 2  ;;  %v1116_v39 = vrot.slane %v2220_v4, 2  ;;  %v1625_v4 = vld [vmem:[%s2375_s4 + $0xa0] sm:$0xff] }
 0x337   :  { %1051 = vst [vmem:[#allocation1 + $0x23] ss:$4 sm:$0xff] %v1828_v11  ;;  %v1610_v11 = vld [vmem:[%s2375_s4 + $0x78] sm:$0xff] }
 0x338   :  { %1261 = vmatpush.msra.mxu0 %v1610_v11  ;;  %v1142_v50 = vrot.slane %v1116_v39, 7 }
 0x33a   :  { %v1003_v21 = vld.sshfl [vmem:[#allocation1] sm:$0xff pattern:$0x73625140]  ;;  %1262 = vmatpush.msra.mxu0 %v1609_v35  ;;  %v1144_v2 = vrot.slane %v1142_v50, 2  ;;  %v1143_v10 = vsel %vm2118_vm8, %v1141_v62, %v1142_v50  ;;  %v1084_v62 = vpop.permute.xlu1 %1083 }
 0x33b   :  { %1599 = vmatmul.msk.f32.vlgmr.msrb.gmra.mxu1 %vm419_vm10, %v1003_v21  ;;  %1037 = vst [vmem:[#allocation1] ss:$4 sm:$0xff] %v1797_v57  ;;  %v1158_v57 = vrot.slane %v1123_v8, 7 }
 0x33c   :  { %1039 = vst [vmem:[#allocation1 + $0x1] ss:$4 sm:$0xff] %v1800_v58  ;;  %v1149_v58 = vsel %vm2118_vm8, %v1147_v37, %v1612_v40  ;;  %1263 = vmatpush.msra.mxu0 %v1608_v34  ;;  %v1146_v12 = vsel %vm2118_vm8, %v1144_v2, %v1145_v26  ;;  %v1627_v26 = vld [vmem:[%s2375_s4 + $0xb0] sm:$0xff] }
 0x33d   :  { %1041 = vst [vmem:[#allocation1 + $0x2] ss:$4 sm:$0xff] %v1803_v59  ;;  %v1153_v59 = vsel %vm2118_vm8, %v1613_v15, %v1152_v32  ;;  %v1160_v18 = vrot.slane %v1158_v57, 2 }
 0x33e   :  { %1043 = vst [vmem:[#allocation1 + $0x3] ss:$4 sm:$0xff] %v1809_v60  ;;  %v1053_v46 = vld.sshfl [vmem:[#allocation1 + $0x20] sm:$0xff pattern:$0x73625140]  ;;  %1264 = vmatpush.msra.mxu0 %v1607_v43  ;;  %v1159_v60 = vsel %vm2118_vm8, %v1157_v42, %v1158_v57 }
 0x33f   :  { %1179 = vst [vmem:[#allocation1 + $0x20] ss:$4 sm:$0xff] %v1149_v58  ;;  %v1162_v22 = vsel %vm2118_vm8, %v1160_v18, %v1161_v13 }
 0x340   :  { %1181 = vst [vmem:[#allocation1 + $0x21] ss:$4 sm:$0xff] %v1153_v59 }
 0x341   :  { %1183 = vst [vmem:[#allocation1 + $0x22] ss:$4 sm:$0xff] %v1156_v0 }
 0x342   :  { %1185 = vst [vmem:[#allocation1 + $0x23] ss:$4 sm:$0xff] %v1159_v60 }
 0x343   :  { %1600 = vmatmul.msk.f32.gmra.mxu1 %vm419_vm10, %v1004_v20  ;;  %v1614_v20 = vrot.slane %v1132_v17, 9 }
 0x345   :  { %v1052_v5 = vld.sshfl [vmem:[#allocation1] sm:$0xff pattern:$0x73625140]  ;;  %v1165_v23 = vsel %vm2118_vm8, %v1163_v19, %v1614_v20 }
 0x346   :  { %1605 = vmatmul.msk.f32.vlgmr.msra.gmra.mxu2 %vm419_vm10, %v1052_v5  ;;  %1171 = vst [vmem:[#allocation1] ss:$4 sm:$0xff] %v1137_v3 }
 0x347   :  { %1173 = vst [vmem:[#allocation1 + $0x1] ss:$4 sm:$0xff] %v1140_v7 }
 0x348   :  { %1175 = vst [vmem:[#allocation1 + $0x2] ss:$4 sm:$0xff] %v1143_v10 }
 0x349   :  { %1177 = vst [vmem:[#allocation1 + $0x3] ss:$4 sm:$0xff] %v1146_v12  ;;  %v1187_v16 = vld.sshfl [vmem:[#allocation1 + $0x20] sm:$0xff pattern:$0x73625140] }
 0x34a   :  { %1231 = vst [vmem:[#allocation1 + $0x20] ss:$4 sm:$0xff] %v2193_v56 }
 0x34b   :  { %1233 = vst [vmem:[#allocation1 + $0x21] ss:$4 sm:$0xff] %v1118_v31 }
 0x34c   :  { %1235 = vst [vmem:[#allocation1 + $0x22] ss:$4 sm:$0xff] %v1120_v25 }
 0x34d   :  { %1237 = vst [vmem:[#allocation1 + $0x23] ss:$4 sm:$0xff] %v2203_v27 }
 0x34e   :  { %1606 = vmatmul.msk.f32.gmra.mxu2 %vm419_vm10, %v1053_v46  ;;  %1288 = vst.sshfl [vmem:[#allocation1 + $0x30] sm:$0xff pattern:$0x75643120] %v1983_v53 }
 0x350   :  { %v1186_v56 = vld.sshfl [vmem:[#allocation1] sm:$0xff pattern:$0x73625140] }
 0x351   :  { %1619 = vmatmul.msk.f32.vlgmr.msrb.gmra.mxu3 %vm419_vm10, %v1186_v56  ;;  %1188 = vst [vmem:[#allocation1] ss:$4 sm:$0xff] %v1162_v22 }
 0x352   :  { %1189 = vst [vmem:[#allocation1 + $0x1] ss:$4 sm:$0xff] %v1165_v23 }
 0x354   :  { %v1239_v14 = vld.sshfl [vmem:[#allocation1 + $0x20] sm:$0xff pattern:$0x73625140] }
 0x355   :  { %1277 = vst.sshfl [vmem:[#allocation1 + $0x20] sm:$0xff pattern:$0x75643120] %v1980_v51  ;;  %v1290_v61 = vld [vmem:[#allocation1 + $0x31] ss:$2 sm:$0xff] }
 0x356   :  { %v1628_v51 = vld [vmem:[%s2375_s4 + $0xb8] sm:$0xff] }
 0x357   :  { %1340 = vmatpush.msra.mxu1 %v1628_v51 }
 0x359   :  { %1620 = vmatmul.msk.f32.gmra.mxu3 %vm419_vm10, %v1187_v16  ;;  %v1190_v24 = vld.sshfl [vmem:[#allocation1] sm:$0xff pattern:$0x73625140]  ;;  %1341 = vmatpush.msra.mxu1 %v1627_v26 }
 0x35a   :  { %1223 = vst [vmem:[#allocation1] ss:$4 sm:$0xff] %v1110_v44 }
 0x35b   :  { %1225 = vst [vmem:[#allocation1 + $0x1] ss:$4 sm:$0xff] %v1113_v36  ;;  %1342 = vmatpush.msra.mxu1 %v1626_v29 }
 0x35c   :  { %1227 = vst [vmem:[#allocation1 + $0x2] ss:$4 sm:$0xff] %v2246_v38  ;;  %v1285_v53 = vld [vmem:[#allocation1 + $0x20] ss:$2 sm:$0xff]  ;;  %v1287_v25 = vld [vmem:[#allocation1 + $0x21] ss:$2 sm:$0xff] }
 0x35d   :  { %1229 = vst [vmem:[#allocation1 + $0x3] ss:$4 sm:$0xff] %v1116_v39  ;;  %1343 = vmatpush.msra.mxu1 %v1625_v4 }
 0x35e   :  { %1310 = vst [vmem:[#allocation1 + $0x20] ss:$4 sm:$0xff] %v1287_v25  ;;  %v1431_v25 = vld [vmem:[%s2377_s6 + $0x8] sm:$0xff] }
 0x35f   :  { %1312 = vst [vmem:[#allocation1 + $0x21] ss:$4 sm:$0xff] %v1290_v61 }
 0x361   :  { %1621 = vmatmul.msk.f32.gmra.mxu3 %vm419_vm10, %v1190_v24  ;;  %v1432_v24 = vld [vmem:[%s2377_s6 + $0x10] sm:$0xff] }
 0x362   :  { %1455 = vmatpush.msrb.mxu2 %v1432_v24 }
 0x364   :  { %v1238_v27 = vld.sshfl [vmem:[#allocation1] sm:$0xff pattern:$0x73625140] }
 0x365   :  { %1622 = vmatmul.msk.f32.vlgmr.msra.gmra.mxu0 %vm419_vm10, %v1238_v27  ;;  %1240 = vst [vmem:[#allocation1] ss:$4 sm:$0xff] %v1123_v8 }
 0x366   :  { %1241 = vst [vmem:[#allocation1 + $0x1] ss:$4 sm:$0xff] %v1124_v9 }
 0x367   :  { %1276 = vst.sshfl [vmem:[#allocation1 + $0x10] sm:$0xff pattern:$0x75643120] %v1977_v49 }
 0x36d   :  { %1623 = vmatmul.msk.f32.gmra.mxu0 %vm419_vm10, %v1239_v14  ;;  %v1242_v30 = vld.sshfl [vmem:[#allocation1] sm:$0xff pattern:$0x73625140] }
 0x36e   :  { %1275 = vst.sshfl [vmem:[#allocation1] sm:$0xff pattern:$0x75643120] %v1973_v47  ;;  %v1281_v31 = vld [vmem:[#allocation1 + $0x10] ss:$2 sm:$0xff] }
 0x36f   :  { %v1283_v32 = vld [vmem:[#allocation1 + $0x11] ss:$2 sm:$0xff] }
 0x370   :  { %1292 = vst.sshfl [vmem:[#allocation1 + $0x10] sm:$0xff pattern:$0x75643120] %v1990_v6 }
 0x375   :  { %1624 = vmatmul.msk.f32.gmra.mxu0 %vm419_vm10, %v1242_v30  ;;  %v1279_v28 = vld [vmem:[#allocation1 + $0x1] ss:$2 sm:$0xff] }
 0x376   :  { %1291 = vst.sshfl [vmem:[#allocation1] sm:$0xff pattern:$0x75643120] %v1987_v63 }
 0x377   :  { %v1295_v11 = vld [vmem:[#allocation1 + $0x10] ss:$2 sm:$0xff]  ;;  %v1296_v49 = vld [vmem:[#allocation1 + $0x11] ss:$2 sm:$0xff] }
 0x37d   :  { %v1293_v8 = vld [vmem:[#allocation1] ss:$2 sm:$0xff]  ;;  %v1294_v33 = vld [vmem:[#allocation1 + $0x1] ss:$2 sm:$0xff] }
 0x37e   :  { %1302 = vst [vmem:[#allocation1] ss:$4 sm:$0xff] %v1279_v28 }
 0x37f   :  { %1304 = vst [vmem:[#allocation1 + $0x1] ss:$4 sm:$0xff] %v1281_v31 }
 0x380   :  { %1306 = vst [vmem:[#allocation1 + $0x2] ss:$4 sm:$0xff] %v1283_v32 }
 0x381   :  { %1308 = vst [vmem:[#allocation1 + $0x3] ss:$4 sm:$0xff] %v1285_v53  ;;  %v1430_v53 = vld [vmem:[%s2377_s6] sm:$0xff] }
 0x382   :  { %1314 = vst [vmem:[#allocation1 + $0x22] ss:$4 sm:$0xff] %v1293_v8  ;;  %v1653_v61 = vpack.i.bf16 %v1431_v25, %v1430_v53  ;;  %1456 = vmatpush.msrb.mxu2 %v1430_v53 }
 0x383   :  { %1316 = vst [vmem:[#allocation1 + $0x23] ss:$4 sm:$0xff] %v1294_v33 }
 0x384   :  { %1654 = vrot.lane.b32.xlu1 %v1653_v61, %s1694_s3 }
 0x388   :  { %v1317_v47 = vld.sshfl [vmem:[#allocation1] sm:$0xff pattern:$0x73625140] }
 0x389   :  { %1629 = vmatmul.msk.f32.vlgmr.msra.gmra.mxu1 %vm419_vm10, %v1317_v47  ;;  %1319 = vst [vmem:[#allocation1] ss:$4 sm:$0xff] %v1295_v11 }
 0x38a   :  { %1320 = vst [vmem:[#allocation1 + $0x1] ss:$4 sm:$0xff] %v1296_v49  ;;  %v1318_v6 = vld.sshfl [vmem:[#allocation1 + $0x20] sm:$0xff pattern:$0x73625140] }
 0x391   :  { %1630 = vmatmul.msk.f32.gmra.mxu1 %vm419_vm10, %v1318_v6  ;;  %v1321_v35 = vld.sshfl [vmem:[#allocation1] sm:$0xff pattern:$0x73625140] }
 0x399   :  { %1631 = vmatmul.msk.f32.gmra.mxu1 %vm419_vm10, %v1321_v35  ;;  %vm1399_vm10 = vcmask 58368  }
 0x3ac   :  { %v985_v37 = vpop.f32.mrf.mxu3 }
 0x3ad   :  { %v982_v36 = vpop.f32.mrf.mxu0 }
 0x3b8   :  { %v1026_v63 = vpop.f32.mrf.mxu1 }
 0x3b9   :  { %v1027_v50 = vadd.f32 %v1026_v63, %v982_v36 }
 0x3c0   :  { %v1029_v21 = vpop.f32.mrf.mxu1 }
 0x3c1   :  { %v1030_v60 = vadd.f32 %v1029_v21, %v985_v37 }
 0x3c9   :  { %v1075_v39 = vpop.f32.mrf.mxu2 }
 0x3ca   :  { %v1081_v55 = vadd.f32 %v1075_v39, %v1027_v50 }
 0x3cc   :  { %v1086_v9 = vadd.f32 %v1084_v62, %v1081_v55  ;;  %v1433_v55 = vld [vmem:[%s2377_s6 + $0x18] sm:$0xff] }
 0x3ce   :  { %v1088_v22 = vmax.f32 %v1086_v9, 0.0 }
 0x3d0   :  { %v1090_v26 = vsel %vm572_vm1, %v1088_v22, -inf }
 0x3d1   :  { %v1078_v0 = vpop.f32.mrf.mxu2  ;;  %v1091_v28 = vrot.slane %v1090_v26, 4 }
 0x3d2   :  { %v1082_v2 = vadd.f32 %v1078_v0, %v1030_v60 }
 0x3d3   :  { %v1092_v49 = vmax.f32 %v1090_v26, %v1091_v28 }
 0x3d4   :  { %v1214_v38 = vpop.f32.mrf.mxu3  ;;  %v1087_v12 = vadd.f32 %v1084_v62, %v1082_v2  ;;  %v1660_v62 = vld [vmem:[%s2377_s6 + $0x20] ss:$0 sm:$0xff]  ;;  %v1648_v2 = vpack.i.bf16 %v1433_v55, %v1432_v24 }
 0x3d5   :  { %v1093_v21 = vrot.slane %v1092_v49, 2 }
 0x3d6   :  { %v1089_v23 = vmax.f32 %v1087_v12, 0.0  ;;  %1649 = vrot.lane.b32.xlu0 %v1648_v2, %s1694_s3 }
 0x3d8   :  { %v1097_v29 = vsel %vm572_vm1, %v1089_v23, -inf }
 0x3d9   :  { %v1098_v8 = vrot.slane %v1097_v29, 4 }
 0x3db   :  { %v1099_v47 = vmax.f32 %v1097_v29, %v1098_v8 }
 0x3dc   :  { %v1217_v44 = vpop.f32.mrf.mxu3 }
 0x3e2   :  { %v1266_v34 = vpop.f32.mrf.mxu0 }
 0x3e3   :  { %v1267_v40 = vadd.f32 %v1266_v34, %v1214_v38  ;;  %v1100_v34 = vrot.slane %v1099_v47, 2 }
 0x3e4   :  { %v1220_v10 = vpop.f32.mrf.mxu3 }
 0x3ea   :  { %v1269_v57 = vpop.f32.mrf.mxu0 }
 0x3eb   :  { %v1270_v58 = vadd.f32 %v1269_v57, %v1217_v44 }
 0x3f2   :  { %v1272_v5 = vpop.f32.mrf.mxu0 }
 0x3f3   :  { %v1273_v13 = vadd.f32 %v1272_v5, %v1220_v10 }
 0x406   :  { %v1345_v15 = vpop.f32.mrf.mxu1 }
 0x407   :  { %v1354_v42 = vadd.f32 %v1345_v15, %v1267_v40  ;;  %v1094_v15 = vmax.f32 %v1092_v49, %v1093_v21 }
 0x409   :  { %v1360_v43 = vadd.f32 %v1358_v41, %v1354_v42  ;;  %v1095_v44 = vrot.slane %v1094_v15, 1 }
 0x40b   :  { %v1363_v45 = vmax.f32 %v1360_v43, 0.0 }
 0x40d   :  { %v1369_v46 = vrot.slane %v1363_v45, 2  ;;  %v1370_v48 = vrot.slane %v1363_v45, 4  ;;  %v1371_v59 = vrot.slane %v1363_v45, 6  ;;  %1376 = vst [vmem:[#allocation1] ss:$4 sm:$0xff] %v1363_v45 }
 0x40e   :  { %v1348_v52 = vpop.f32.mrf.mxu1 }
 0x40f   :  { %1378 = vst [vmem:[#allocation1 + $0x1] ss:$4 sm:$0xff] %v1369_v46  ;;  %v1355_v54 = vadd.f32 %v1348_v52, %v1270_v58 }
 0x410   :  { %1380 = vst [vmem:[#allocation1 + $0x2] ss:$4 sm:$0xff] %v1370_v48 }
 0x411   :  { %1382 = vst [vmem:[#allocation1 + $0x3] ss:$4 sm:$0xff] %v1371_v59  ;;  %v1361_v3 = vadd.f32 %v1358_v41, %v1355_v54  ;;  %v1096_v59 = vmax.f32 %v1094_v15, %v1095_v44 }
 0x413   :  { %v1364_v7 = vmax.f32 %v1361_v3, 0.0 }
 0x415   :  { %v1372_v16 = vrot.slane %v1364_v7, 2  ;;  %1384 = vst [vmem:[#allocation1 + $0x20] ss:$4 sm:$0xff] %v1364_v7  ;;  %v1373_v17 = vrot.slane %v1364_v7, 4  ;;  %v1374_v19 = vrot.slane %v1364_v7, 6 }
 0x416   :  { %v1351_v18 = vpop.f32.mrf.mxu1 }
 0x417   :  { %v1356_v20 = vadd.f32 %v1351_v18, %v1273_v13  ;;  %v1655_v18 = vpop.permute.xlu1 %1654 }
 0x418   :  { %v1385_v56 = vld.sshfl [vmem:[#allocation1] sm:$0xff pattern:$0x73625140] }
 0x419   :  { %v1362_v14 = vadd.f32 %v1358_v41, %v1356_v20  ;;  %1387 = vst [vmem:[#allocation1] ss:$4 sm:$0xff] %v1372_v16  ;;  %v1398_v30 = vsel %vm572_vm1, %v1385_v56, -inf  ;;  %v1101_v41 = vmax.f32 %v1099_v47, %v1100_v34  ;;  %v1656_v20 = vunpack.i.l.bf16 %v1655_v18 }
 0x41a   :  { %1388 = vst [vmem:[#allocation1 + $0x1] ss:$4 sm:$0xff] %v1373_v17 }
 0x41b   :  { %v1365_v51 = vmax.f32 %v1362_v14, 0.0  ;;  %1389 = vst [vmem:[#allocation1 + $0x2] ss:$4 sm:$0xff] %v1374_v19  ;;  %v1102_v45 = vrot.slane %v1101_v41, 1  ;;  %v1657_v19 = vunpack.i.h.bf16 %v1655_v18 }
 0x41c   :  { %v1386_v27 = vld.sshfl [vmem:[#allocation1 + $0x20] sm:$0xff pattern:$0x73625140] }
 0x41d   :  { %v1375_v4 = vrot.slane %v1365_v51, 2  ;;  %1390 = vst [vmem:[#allocation1 + $0x3] ss:$4 sm:$0xff] %v1365_v51  ;;  %v1400_v31 = vsel %vm1399_vm10, %v1386_v27, -inf  ;;  %v1103_v50 = vmax.f32 %v1101_v41, %v1102_v45 }
 0x41e   :  { %v1401_v32 = vmax.f32 %v1398_v30, %v1400_v31 }
 0x41f   :  { %1391 = vst [vmem:[#allocation1 + $0x20] ss:$4 sm:$0xff] %v1375_v4 }
 0x420   :  { %v1402_v33 = vrot.slane %v1401_v32, 4 }
 0x422   :  { %v1403_v11 = vmax.f32 %v1401_v32, %v1402_v33 }
 0x424   :  { %v1392_v6 = vld.sshfl [vmem:[#allocation1] sm:$0xff pattern:$0x73625140]  ;;  %v1404_v63 = vrot.slane %v1403_v11, 2 }
 0x425   :  { %v1408_v36 = vsel %vm572_vm1, %v1392_v6, -inf }
 0x426   :  { %v1393_v35 = vld.sshfl [vmem:[#allocation1 + $0x20] sm:$0xff pattern:$0x73625140]  ;;  %v1405_v39 = vmax.f32 %v1403_v11, %v1404_v63 }
 0x427   :  { %v1409_v37 = vsel %vm1399_vm10, %v1393_v35, -inf }
 0x428   :  { %v1410_v38 = vmax.f32 %v1408_v36, %v1409_v37  ;;  %v1406_v57 = vrot.slane %v1405_v39, 1 }
 0x42a   :  { %v1411_v40 = vrot.slane %v1410_v38, 4  ;;  %v1407_v46 = vmax.f32 %v1405_v39, %v1406_v57 }
 0x42c   :  { %v1412_v42 = vmax.f32 %v1410_v38, %v1411_v40  ;;  %v1417_v52 = vmax.f32 %v1096_v59, %v1407_v46 }
 0x42e   :  { %v1413_v43 = vrot.slane %v1412_v42, 2 }
 0x430   :  { %v1414_v58 = vmax.f32 %v1412_v42, %v1413_v43 }
 0x432   :  { %v1415_v48 = vrot.slane %v1414_v58, 1 }
 0x434   :  { %v1416_v0 = vmax.f32 %v1414_v58, %v1415_v48 }
 0x436   :  { %v1418_v60 = vmax.f32 %v1103_v50, %v1416_v0 }
 0x438   :  { %v1425_v54 = vsel %vm285_vm11, %v1418_v60, %v1417_v52  ;;  %vm1498_vm11 = vcmask 916480  }
 0x439   :  { %1426 = vrot.lane.b32.xlu2 %v1425_v54, %s1696_s0  ;;  %v1499_v56 = vsel %vm1498_vm11, %v1656_v20, %v1657_v19 }
 0x441   :  { %1505 = vrot.lane.b32.xlu2 %v1660_v62, %s1694_s3 }
 0x448   :  { %v1650_v12 = vpop.permute.xlu0 %1649 }
 0x449   :  { %v1652_v16 = vunpack.i.h.bf16 %v1650_v12  ;;  %v1651_v17 = vunpack.i.l.bf16 %v1650_v12 }
 0x44b   :  { %v1500_v22 = vsel %vm1498_vm11, %v1651_v17, %v1652_v16 }
 0x44c   :  { %1528 = vmatpush.msra.mxu2 %v1500_v22 }
 0x44e   :  { %1529 = vmatpush.msra.mxu2 %v1499_v56 }
 0x493   :  { %v1427_v3 = vpop.permute.xlu2 %1426 }
 0x494   :  { %v1429_v5 = vsel %vm572_vm1, %v2211_v1, %v1427_v3  ;;  %v1661_v1 = vld [vmem:[%s2377_s6 + $0x28] ss:$0 sm:$0xff]  ;;  %s1697_s6 = smov [#allocation2]  }
 0x495   :  { %1632 = vmatmul.msk.f32.vlgmr.msrb.gmra.mxu2 %vm1437_vm12, %v1429_v5  ;;  %1507 = vrot.lane.b32.xlu0 %v1661_v1, %s1694_s3  ;;  %s1540_s3 = sshll.u32 %s1697_s6, 4  ;;  %s1541_s3 = int_to_ptr.vmem [resolvable:$true] %s1540_s3 }
 0x49b   :  { %v1506_v49 = vpop.permute.xlu2 %1505 }
 0x507   :  { %v1508_v11 = vpop.permute.xlu0 %1507 }
 0x508   :  { %v1509_v47 = vsel %vm1498_vm11, %v1506_v49, %v1508_v11 }
 0x518   :  { %v1458_v7 = vpop.f32.mrf.mxu2 }
 0x519   :  { %v1459_v9 = vadd.f32 %v1660_v62, %v1458_v7 }
 0x51b   :  { %v1461_v10 = vsub.f32 0.0, %v1459_v9  ;;  %v1480_v31 = vmax.f32 %v1459_v9, 0.0 }
 0x51d   :  { %v1462_v13 = vmul.f32 1.442695, %v1461_v10 }
 0x51f   :  { %1662 = vpow2.f32 %v1462_v13 }
 0x525   :  { %v1663_v23 = vpop.eup %1662 }
 0x526   :  { %v1464_v14 = vadd.f32 1.0, %v1663_v23 }
 0x528   :  { %1664 = vrcp.f32 %v1464_v14  ;;  %v1476_v61 = vand.u32 2147483648, %v1464_v14  ;;  %v1474_v26 = vand.u32 2147483647, %v1464_v14  ;;  %vm1470_vm14 = vweird.f32 %v1464_v14 }
 0x52a   :  { %v1477_v29 = vor.u32 1.1754944e-38, %v1476_v61  ;;  %vm1475_vm0 = vcmp.eq.f32.partialorder %v1474_v26, 8.507059e+37 }
 0x52e   :  { %v1665_v24 = vpop.eup %1664 }
 0x52f   :  { %v1466_v53 = vmul.f32 %v1665_v24, %v1464_v14  ;;  %vm1471_vm13 = vweird.f32 %v1665_v24 }
 0x530   :  { %vm1472_vm15 = vmor %vm1470_vm14, %vm1471_vm13 }
 0x531   :  { %v1467_v25 = vsub.f32 1.0, %v1466_v53 }
 0x533   :  { %v1468_v51 = vmul.f32 %v1665_v24, %v1467_v25 }
 0x535   :  { %v1469_v27 = vadd.f32 %v1665_v24, %v1468_v51 }
 0x537   :  { %v1473_v4 = vsel %vm1472_vm15, %v1665_v24, %v1469_v27 }
 0x538   :  { %v1478_v30 = vsel %vm1475_vm0, %v1477_v29, %v1473_v4 }
 0x539   :  { %v1482_v32 = vsub.f32 1.0, %v1478_v30  ;;  %v1481_v28 = vmul.f32 %v1480_v31, %v1478_v30 }
 0x53b   :  { %v1483_v8 = vmul.f32 %v1482_v32, %v1429_v5 }
 0x53d   :  { %v1484_v33 = vadd.f32 %v1483_v8, %v1481_v28 }
 0x53f   :  { %1633 = vmatmul.msk.f32.vlgmr.msra.gmra.mxu2 %vm1437_vm12, %v1484_v33 }
 0x5c2   :  { %v1531_v6 = vpop.f32.mrf.mxu2 }
 0x5c3   :  { %v1532_v35 = vadd.f32 %v1531_v6, %v1509_v47 }
 0x5c5   :  { %1534 = vst [vmem:[#allocation2] sm:$0x3] %v1532_v35 }
 0x5c6   :  { %1545 = dma.vmem_to_hbm [thread:$0]  %s1541_s3, 32, %s1543_s22, [#allocation3]  }
 0x5c7   :  { %1690 = dma.done.wait [#allocation3], 32  }
 0x5c8   :  { %1691 = vsyncadd [#allocation3], 4294967264 }
 0x5c9   :  { %1550 = vsyncpa [#allocation3], 1 }

</bundles_post_ra>
